<compile_context>
chip_gen: v6e
topology: v6e:2x2x1
jax: 0.10.0
libtpu: 0.0.40
codegen_flags: <defaults>
</compile_context>

<pallas_src>
import math

import jax
import jax.numpy as jnp
from jax.experimental import pallas as pl
from jax.experimental.pallas import tpu as pltpu

# ---------------- config ----------------
VOCAB = 64
MAX_POS = 16
HIDDEN = 32
HEADS = 4
HEAD_DIM = HIDDEN // HEADS
LAYERS = 2
INTERMEDIATE = 64
N_CLASSES = 3
LN_EPS = 1e-12


# ---------------- in-kernel helpers ----------------
def _gelu(x):
    # tanh-approximate GELU.
    # TODO(synk): switch to exact erf GELU if bit-level parity with HF BERT is required.
    c = math.sqrt(2.0 / math.pi)
    return 0.5 * x * (1.0 + jnp.tanh(c * (x + 0.044715 * x * x * x)))


def _layernorm(x, g, b, eps=LN_EPS):
    # Single-pass LN: mean and mean-of-squares reductions are independent.
    mu = jnp.mean(x, axis=-1, keepdims=True)
    ms = jnp.mean(x * x, axis=-1, keepdims=True)
    var = jnp.maximum(ms - mu * mu, 0.0)
    return (x - mu) * jax.lax.rsqrt(var + eps) * g + b


# ---------------- fused Pallas kernel (one batch element per grid step) ----------------
def fused_bert_kernel(ids_ref, mask_ref, emb_ref, qkv_w_ref, wo_ref,
                      w1_ref, w2_ref, head_w_ref, lvec_ref, mvec_ref, out_ref):
    S = ids_ref.shape[-1]
    H = HIDDEN

    # ---- embeddings: in-kernel gather as one-hot @ table (single MXU op) ----
    ids = ids_ref[0, :, :].reshape(S, 1)                                  # (S, 1) int32
    tok_iota = jax.lax.broadcasted_iota(jnp.int32, (S, VOCAB), 1)
    onehot = (tok_iota == ids).astype(jnp.float32)                        # (S, VOCAB)
    word = jnp.dot(onehot, emb_ref[0:VOCAB, :], preferred_element_type=jnp.float32)
    pos = emb_ref[VOCAB:VOCAB + S, :]                                     # (S, H)
    typ = emb_ref[VOCAB + MAX_POS:VOCAB + MAX_POS + 1, :]                 # token_type_ids == 0
    x = _layernorm(word + pos + typ, mvec_ref[0:1, :H], mvec_ref[1:2, :H])

    # ---- additive attention-mask bias, materialized ONCE and reused by all layers ----
    maskf = mask_ref[0, :, :].astype(jnp.float32)                         # (1, S)
    bias = jnp.broadcast_to(((1.0 - maskf) * -1e9)[None, :, :], (HEADS, S, S))

    for li in range(LAYERS):                                              # static unroll
        # fused QKV projection (scale already folded into the Q columns at init)
        qkv = jnp.dot(x, qkv_w_ref[li], preferred_element_type=jnp.float32)     # (S, 3H)
        q = (qkv[:, 0:H] + lvec_ref[li, 0:1, :H]).reshape(S, HEADS, HEAD_DIM)
        k = (qkv[:, H:2 * H] + lvec_ref[li, 1:2, :H]).reshape(S, HEADS, HEAD_DIM)
        v = (qkv[:, 2 * H:3 * H] + lvec_ref[li, 2:3, :H]).reshape(S, HEADS, HEAD_DIM)

        # all heads in one shot: one score einsum, one softmax, one context einsum
        s = jnp.einsum('qhd,khd->hqk', q, k, preferred_element_type=jnp.float32) + bias
        s = s - jnp.max(s, axis=-1, keepdims=True)                        # stable softmax
        p = jnp.exp(s)
        p = p * pl.reciprocal(jnp.sum(p, axis=-1, keepdims=True), approx=True)
        ctx = jnp.einsum('hqk,khd->qhd', p, v, preferred_element_type=jnp.float32)  # (S,HEADS,D)

        attn = jnp.dot(ctx.reshape(S, H), wo_ref[li], preferred_element_type=jnp.float32)
        attn = attn + lvec_ref[li, 3:4, :H]
        x = _layernorm(x + attn, lvec_ref[li, 4:5, :H], lvec_ref[li, 5:6, :H])

        # feed-forward
        ff = _gelu(jnp.dot(x, w1_ref[li], preferred_element_type=jnp.float32)
                   + lvec_ref[li, 6:7, :INTERMEDIATE])
        ff = jnp.dot(ff, w2_ref[li], preferred_element_type=jnp.float32) + lvec_ref[li, 7:8, :H]
        x = _layernorm(x + ff, lvec_ref[li, 8:9, :H], lvec_ref[li, 9:10, :H])

    # ---- pooler (tanh dense on [CLS]) + Dropout(identity at eval) + classifier ----
    cls_tok = x[0:1, :]                                                   # (1, H)
    pooled = jnp.tanh(
        jnp.dot(cls_tok, head_w_ref[:, 0:H], preferred_element_type=jnp.float32)
        + mvec_ref[2:3, :H])
    logits = (jnp.dot(pooled, head_w_ref[:, H:H + N_CLASSES],
                      preferred_element_type=jnp.float32)
              + mvec_ref[3:4, :N_CLASSES])
    out_ref[...] = logits.reshape(1, 1, N_CLASSES)


# ---------------- parameter init (deterministic, synthetic, pre-packed) ----------------
def init_params(key):
    def nrm(k, shape, scale=0.02):
        return scale * jax.random.normal(k, shape, dtype=jnp.float32)

    def pad128(v):
        return jnp.pad(v, (0, 128 - v.shape[0]))

    keys = jax.random.split(key, 8 + LAYERS)

    word_emb = nrm(keys[0], (VOCAB, HIDDEN))
    pos_emb = nrm(keys[1], (MAX_POS, HIDDEN))
    type_emb = nrm(keys[2], (2, HIDDEN))
    emb_table = jnp.concatenate([word_emb, pos_emb, type_emb], axis=0)    # (82, H)

    pooler_w = nrm(keys[3], (HIDDEN, HIDDEN))
    cls_w = nrm(keys[4], (HIDDEN, N_CLASSES))
    head_w = jnp.concatenate([pooler_w, cls_w], axis=1)                   # (H, H+C)

    # misc vectors: emb-LN gamma/beta, pooler bias, classifier bias  -> (4, 128)
    misc_vec = jnp.stack([
        pad128(jnp.ones((HIDDEN,), jnp.float32)),
        pad128(jnp.zeros((HIDDEN,), jnp.float32)),
        pad128(jnp.zeros((HIDDEN,), jnp.float32)),
        pad128(jnp.zeros((N_CLASSES,), jnp.float32)),
    ], axis=0)

    att_scale = 1.0 / math.sqrt(HEAD_DIM)
    qkv_w, wo, w1, w2, layer_vec = [], [], [], [], []
    zh = jnp.zeros((HIDDEN,), jnp.float32)
    oh = jnp.ones((HIDDEN,), jnp.float32)
    for li in range(LAYERS):
        lk = jax.random.split(keys[8 + li], 6)
        wq = nrm(lk[0], (HIDDEN, HIDDEN)) * att_scale     # 1/sqrt(d) folded into Q weights
        wk = nrm(lk[1], (HIDDEN, HIDDEN))
        wv = nrm(lk[2], (HIDDEN, HIDDEN))
        qkv_w.append(jnp.concatenate([wq, wk, wv], axis=1))               # (H, 3H)
        wo.append(nrm(lk[3], (HIDDEN, HIDDEN)))
        w1.append(nrm(lk[4], (HIDDEN, INTERMEDIATE)))
        w2.append(nrm(lk[5], (INTERMEDIATE, HIDDEN)))
        layer_vec.append(jnp.stack([
            pad128(zh * att_scale),                              # q bias (scale folded)
            pad128(zh),                                          # k bias
            pad128(zh),                                          # v bias
            pad128(zh),                                          # attn output bias
            pad128(oh),                                          # LN1 gamma
            pad128(zh),                                          # LN1 beta
            pad128(jnp.zeros((INTERMEDIATE,), jnp.float32)),     # FFN b1
            pad128(zh),                                          # FFN b2
            pad128(oh),                                          # LN2 gamma
            pad128(zh),                                          # LN2 beta
        ], axis=0))                                              # (10, 128)

    return {
        "emb_table": emb_table,                                  # (82, H)
        "qkv_w": jnp.stack(qkv_w),                               # (L, H, 3H)
        "wo": jnp.stack(wo),                                     # (L, H, H)
        "w1": jnp.stack(w1),                                     # (L, H, I)
        "w2": jnp.stack(w2),                                     # (L, I, H)
        "head_w": head_w,                                        # (H, H + C)
        "layer_vec": jnp.stack(layer_vec),                       # (L, 10, 128)
        "misc_vec": misc_vec,                                    # (4, 128)
    }


# ---------------- full forward ----------------
def sentiment_classifier(params, input_ids, attention_mask):
    B, S = input_ids.shape
    ids = input_ids.reshape(B, 1, S).astype(jnp.int32)
    mask = attention_mask.reshape(B, 1, S).astype(jnp.int32)

    out = pl.pallas_call(
        fused_bert_kernel,
        grid=(B,),
        in_specs=[
            pl.BlockSpec((1, 1, S), lambda b: (b, 0, 0)),                      # ids
            pl.BlockSpec((1, 1, S), lambda b: (b, 0, 0)),                      # mask
            pl.BlockSpec(params["emb_table"].shape, lambda b: (0, 0)),         # emb table
            pl.BlockSpec(params["qkv_w"].shape, lambda b: (0, 0, 0)),          # fused QKV
            pl.BlockSpec(params["wo"].shape, lambda b: (0, 0, 0)),             # attn out proj
            pl.BlockSpec(params["w1"].shape, lambda b: (0, 0, 0)),             # FFN in
            pl.BlockSpec(params["w2"].shape, lambda b: (0, 0, 0)),             # FFN out
            pl.BlockSpec(params["head_w"].shape, lambda b: (0, 0)),            # pooler+cls W
            pl.BlockSpec(params["layer_vec"].shape, lambda b: (0, 0, 0)),      # packed per-layer vecs
            pl.BlockSpec(params["misc_vec"].shape, lambda b: (0, 0)),          # packed misc vecs
        ],
        out_specs=pl.BlockSpec((1, 1, N_CLASSES), lambda b: (b, 0, 0)),
        out_shape=jax.ShapeDtypeStruct((B, 1, N_CLASSES), jnp.float32),
        compiler_params=pltpu.CompilerParams(
            dimension_semantics=("parallel",)),                # batch sharded across TCs (v7x)
    )(ids, mask,
      params["emb_table"], params["qkv_w"], params["wo"],
      params["w1"], params["w2"], params["head_w"],
      params["layer_vec"], params["misc_vec"])
    return out.reshape(B, N_CLASSES)


if __name__ == "__main__":
    key = jax.random.PRNGKey(0)
    pkey, ikey = jax.random.split(key)

    params = init_params(pkey)

    B, S = 2, 8
    input_ids = jax.random.randint(ikey, (B, S), 0, VOCAB, dtype=jnp.int32)
    attention_mask = jnp.array([[1, 1, 1, 1, 1, 1, 1, 1],
                                [1, 1, 1, 1, 1, 0, 0, 0]], dtype=jnp.int32)

    fwd = jax.jit(sentiment_classifier)
    logits = fwd(params, input_ids, attention_mask)
    logits = jax.block_until_ready(logits)
    assert logits.shape == (B, N_CLASSES) and logits.dtype == jnp.float32
    assert bool(jnp.all(jnp.isfinite(logits)))
    print("KERNEL_OK")
</pallas_src>

<mosaic_0001>
module attributes {stable_mosaic.version = 11 : i64} {
  func.func @fused_bert_kernel(%arg0: i32, %arg1: memref<1x1x8xi32, #tpu.memory_space<vmem>>, %arg2: memref<1x1x8xi32, #tpu.memory_space<vmem>>, %arg3: memref<82x32xf32, #tpu.memory_space<vmem>>, %arg4: memref<2x32x96xf32, #tpu.memory_space<vmem>>, %arg5: memref<2x32x32xf32, #tpu.memory_space<vmem>>, %arg6: memref<2x32x64xf32, #tpu.memory_space<vmem>>, %arg7: memref<2x64x32xf32, #tpu.memory_space<vmem>>, %arg8: memref<32x35xf32, #tpu.memory_space<vmem>>, %arg9: memref<2x10x128xf32, #tpu.memory_space<vmem>>, %arg10: memref<4x128xf32, #tpu.memory_space<vmem>>, %arg11: memref<1x1x3xf32, #tpu.memory_space<vmem>>) attributes {dimension_semantics = [#tpu.dimension_semantics<parallel>], iteration_bounds = array<i64: 2>, scalar_prefetch = 0 : i64, scratch_operands = 0 : i64, tpu.core_type = #tpu.core_type<tc>, window_params = [{transform_indices = @transform_0, window_bounds = array<i64: 1, 1, 8>}, {transform_indices = @transform_1, window_bounds = array<i64: 1, 1, 8>}, {pipeline_mode = #tpu.pipeline_mode<synchronous>, transform_indices = @transform_2, window_bounds = array<i64: 82, 32>}, {pipeline_mode = #tpu.pipeline_mode<synchronous>, transform_indices = @transform_3, window_bounds = array<i64: 2, 32, 96>}, {pipeline_mode = #tpu.pipeline_mode<synchronous>, transform_indices = @transform_4, window_bounds = array<i64: 2, 32, 32>}, {pipeline_mode = #tpu.pipeline_mode<synchronous>, transform_indices = @transform_5, window_bounds = array<i64: 2, 32, 64>}, {pipeline_mode = #tpu.pipeline_mode<synchronous>, transform_indices = @transform_6, window_bounds = array<i64: 2, 64, 32>}, {pipeline_mode = #tpu.pipeline_mode<synchronous>, transform_indices = @transform_7, window_bounds = array<i64: 32, 35>}, {pipeline_mode = #tpu.pipeline_mode<synchronous>, transform_indices = @transform_8, window_bounds = array<i64: 2, 10, 128>}, {pipeline_mode = #tpu.pipeline_mode<synchronous>, transform_indices = @transform_9, window_bounds = array<i64: 4, 128>}, {transform_indices = @transform_10, window_bounds = array<i64: 1, 1, 3>}]} {
    %c0 = arith.constant 0 : index
    %c0_0 = arith.constant 0 : index
    %c0_1 = arith.constant 0 : index
    %0 = vector.load %arg1[%c0, %c0_0, %c0_1] : memref<1x1x8xi32, #tpu.memory_space<vmem>>, vector<1x1x8xi32>
    %1 = vector.shape_cast %0 : vector<1x1x8xi32> to vector<1x8xi32>
    %2 = vector.shape_cast %1 : vector<1x8xi32> to vector<8x1xi32>
    %3 = tpu.iota {dimensions = array<i32: 1>} : vector<8x64xi32>
    %4 = vector.broadcast %2 : vector<8x1xi32> to vector<8x64xi32>
    %5 = arith.cmpi eq, %3, %4 : vector<8x64xi32>
    %6 = arith.extui %5 : vector<8x64xi1> to vector<8x64xi32>
    %7 = arith.sitofp %6 : vector<8x64xi32> to vector<8x64xf32>
    %c0_2 = arith.constant 0 : index
    %c0_3 = arith.constant 0 : index
    %8 = vector.load %arg3[%c0_2, %c0_3] : memref<82x32xf32, #tpu.memory_space<vmem>>, vector<64x32xf32>
    %cst = arith.constant dense<0.000000e+00> : vector<8x32xf32>
    %9 = tpu.matmul %7, %8, %cst {dimension_numbers = #tpu.dot_dimension_numbers<[1], [0], [0], [1], [0, 0, 1, 1], [], []>} : vector<8x64xf32>, vector<64x32xf32>, vector<8x32xf32> -> vector<8x32xf32>
    %c64 = arith.constant 64 : index
    %c0_4 = arith.constant 0 : index
    %10 = vector.load %arg3[%c64, %c0_4] : memref<82x32xf32, #tpu.memory_space<vmem>>, vector<8x32xf32>
    %c80 = arith.constant 80 : index
    %c0_5 = arith.constant 0 : index
    %11 = vector.load %arg3[%c80, %c0_5] : memref<82x32xf32, #tpu.memory_space<vmem>>, vector<1x32xf32>
    %12 = arith.addf %9, %10 : vector<8x32xf32>
    %13 = vector.broadcast %11 : vector<1x32xf32> to vector<8x32xf32>
    %14 = arith.addf %12, %13 : vector<8x32xf32>
    %c0_6 = arith.constant 0 : index
    %c0_7 = arith.constant 0 : index
    %15 = vector.load %arg10[%c0_6, %c0_7] : memref<4x128xf32, #tpu.memory_space<vmem>>, vector<1x32xf32>
    %c1 = arith.constant 1 : index
    %c0_8 = arith.constant 0 : index
    %16 = vector.load %arg10[%c1, %c0_8] : memref<4x128xf32, #tpu.memory_space<vmem>>, vector<1x32xf32>
    %cst_9 = arith.constant dense<0.000000e+00> : vector<8xf32>
    %17 = vector.multi_reduction <add>, %14, %cst_9 [1] : vector<8x32xf32> to vector<8xf32>
    %18 = vector.shape_cast %17 : vector<8xf32> to vector<8x1xf32>
    %cst_10 = arith.constant 3.200000e+01 : f32
    %19 = vector.broadcast %cst_10 : f32 to vector<8x1xf32>
    %20 = arith.divf %18, %19 : vector<8x1xf32>
    %21 = arith.mulf %14, %14 : vector<8x32xf32>
    %cst_11 = arith.constant dense<0.000000e+00> : vector<8xf32>
    %22 = vector.multi_reduction <add>, %21, %cst_11 [1] : vector<8x32xf32> to vector<8xf32>
    %23 = vector.shape_cast %22 : vector<8xf32> to vector<8x1xf32>
    %cst_12 = arith.constant 3.200000e+01 : f32
    %24 = vector.broadcast %cst_12 : f32 to vector<8x1xf32>
    %25 = arith.divf %23, %24 : vector<8x1xf32>
    %26 = arith.mulf %20, %20 : vector<8x1xf32>
    %27 = arith.subf %25, %26 : vector<8x1xf32>
    %cst_13 = arith.constant 0.000000e+00 : f32
    %28 = vector.broadcast %cst_13 : f32 to vector<8x1xf32>
    %29 = arith.maximumf %27, %28 : vector<8x1xf32>
    %30 = vector.broadcast %20 : vector<8x1xf32> to vector<8x32xf32>
    %31 = arith.subf %14, %30 : vector<8x32xf32>
    %cst_14 = arith.constant 9.99999996E-13 : f32
    %32 = vector.broadcast %cst_14 : f32 to vector<8x1xf32>
    %33 = arith.addf %29, %32 : vector<8x1xf32>
    %34 = math.rsqrt %33 : vector<8x1xf32>
    %35 = vector.broadcast %34 : vector<8x1xf32> to vector<8x32xf32>
    %36 = arith.mulf %31, %35 : vector<8x32xf32>
    %37 = vector.broadcast %15 : vector<1x32xf32> to vector<8x32xf32>
    %38 = arith.mulf %36, %37 : vector<8x32xf32>
    %39 = vector.broadcast %16 : vector<1x32xf32> to vector<8x32xf32>
    %40 = arith.addf %38, %39 : vector<8x32xf32>
    %c0_15 = arith.constant 0 : index
    %c0_16 = arith.constant 0 : index
    %c0_17 = arith.constant 0 : index
    %41 = vector.load %arg2[%c0_15, %c0_16, %c0_17] : memref<1x1x8xi32, #tpu.memory_space<vmem>>, vector<1x1x8xi32>
    %42 = vector.shape_cast %41 : vector<1x1x8xi32> to vector<1x8xi32>
    %43 = arith.sitofp %42 : vector<1x8xi32> to vector<1x8xf32>
    %cst_18 = arith.constant 1.000000e+00 : f32
    %44 = vector.broadcast %cst_18 : f32 to vector<1x8xf32>
    %45 = arith.subf %44, %43 : vector<1x8xf32>
    %cst_19 = arith.constant -1.000000e+09 : f32
    %46 = vector.broadcast %cst_19 : f32 to vector<1x8xf32>
    %47 = arith.mulf %45, %46 : vector<1x8xf32>
    %48 = vector.shape_cast %47 : vector<1x8xf32> to vector<1x1x8xf32>
    %49 = vector.shape_cast %48 : vector<1x1x8xf32> to vector<1x1x8xf32>
    %50 = vector.broadcast %49 : vector<1x1x8xf32> to vector<4x8x8xf32>
    %c0_20 = arith.constant 0 : index
    %c0_21 = arith.constant 0 : index
    %c0_22 = arith.constant 0 : index
    %51 = vector.load %arg4[%c0_20, %c0_21, %c0_22] : memref<2x32x96xf32, #tpu.memory_space<vmem>>, vector<1x32x96xf32>
    %52 = vector.shape_cast %51 : vector<1x32x96xf32> to vector<32x96xf32>
    %cst_23 = arith.constant dense<0.000000e+00> : vector<8x96xf32>
    %53 = tpu.matmul %40, %52, %cst_23 {dimension_numbers = #tpu.dot_dimension_numbers<[1], [0], [0], [1], [0, 0, 1, 1], [], []>} : vector<8x32xf32>, vector<32x96xf32>, vector<8x96xf32> -> vector<8x96xf32>
    %54 = vector.extract_strided_slice %53 {offsets = [0, 0], sizes = [8, 32], strides = [1, 1]} : vector<8x96xf32> to vector<8x32xf32>
    %c0_24 = arith.constant 0 : index
    %c0_25 = arith.constant 0 : index
    %c0_26 = arith.constant 0 : index
    %55 = vector.load %arg9[%c0_24, %c0_25, %c0_26] : memref<2x10x128xf32, #tpu.memory_space<vmem>>, vector<1x1x32xf32>
    %56 = vector.shape_cast %55 : vector<1x1x32xf32> to vector<1x32xf32>
    %57 = vector.broadcast %56 : vector<1x32xf32> to vector<8x32xf32>
    %58 = arith.addf %54, %57 : vector<8x32xf32>
    %59 = vector.shape_cast %58 : vector<8x32xf32> to vector<8x4x8xf32>
    %60 = vector.extract_strided_slice %53 {offsets = [0, 32], sizes = [8, 32], strides = [1, 1]} : vector<8x96xf32> to vector<8x32xf32>
    %c0_27 = arith.constant 0 : index
    %c1_28 = arith.constant 1 : index
    %c0_29 = arith.constant 0 : index
    %61 = vector.load %arg9[%c0_27, %c1_28, %c0_29] : memref<2x10x128xf32, #tpu.memory_space<vmem>>, vector<1x1x32xf32>
    %62 = vector.shape_cast %61 : vector<1x1x32xf32> to vector<1x32xf32>
    %63 = vector.broadcast %62 : vector<1x32xf32> to vector<8x32xf32>
    %64 = arith.addf %60, %63 : vector<8x32xf32>
    %65 = vector.shape_cast %64 : vector<8x32xf32> to vector<8x4x8xf32>
    %66 = vector.extract_strided_slice %53 {offsets = [0, 64], sizes = [8, 32], strides = [1, 1]} : vector<8x96xf32> to vector<8x32xf32>
    %c0_30 = arith.constant 0 : index
    %c2 = arith.constant 2 : index
    %c0_31 = arith.constant 0 : index
    %67 = vector.load %arg9[%c0_30, %c2, %c0_31] : memref<2x10x128xf32, #tpu.memory_space<vmem>>, vector<1x1x32xf32>
    %68 = vector.shape_cast %67 : vector<1x1x32xf32> to vector<1x32xf32>
    %69 = vector.broadcast %68 : vector<1x32xf32> to vector<8x32xf32>
    %70 = arith.addf %66, %69 : vector<8x32xf32>
    %71 = vector.shape_cast %70 : vector<8x32xf32> to vector<8x4x8xf32>
    "tpu.trace_start"() <{level = 10 : i32, message = "qhd,khd->hqk"}> : () -> ()
    %cst_32 = arith.constant dense<0.000000e+00> : vector<4x8x8xf32>
    %72 = tpu.matmul %59, %65, %cst_32 {dimension_numbers = #tpu.dot_dimension_numbers<[2], [2], [0], [0], [0, 1, 0, 0, 1, 0], [1], [1]>} : vector<8x4x8xf32>, vector<8x4x8xf32>, vector<4x8x8xf32> -> vector<4x8x8xf32>
    "tpu.trace_stop"() : () -> ()
    %73 = arith.addf %72, %50 : vector<4x8x8xf32>
    %cst_33 = arith.constant dense<0xFF800000> : vector<4x8xf32>
    %74 = vector.multi_reduction <maximumf>, %73, %cst_33 [2] : vector<4x8x8xf32> to vector<4x8xf32>
    %75 = vector.shape_cast %74 : vector<4x8xf32> to vector<4x8x1xf32>
    %76 = vector.broadcast %75 : vector<4x8x1xf32> to vector<4x8x8xf32>
    %77 = arith.subf %73, %76 : vector<4x8x8xf32>
    %78 = math.exp %77 : vector<4x8x8xf32>
    %cst_34 = arith.constant dense<0.000000e+00> : vector<4x8xf32>
    %79 = vector.multi_reduction <add>, %78, %cst_34 [2] : vector<4x8x8xf32> to vector<4x8xf32>
    %80 = vector.shape_cast %79 : vector<4x8xf32> to vector<4x8x1xf32>
    %81 = tpu.reciprocal %80 {approx = true} : vector<4x8x1xf32> -> vector<4x8x1xf32>
    %82 = vector.broadcast %81 : vector<4x8x1xf32> to vector<4x8x8xf32>
    %83 = arith.mulf %78, %82 : vector<4x8x8xf32>
    "tpu.trace_start"() <{level = 10 : i32, message = "hqk,khd->qhd"}> : () -> ()
    %cst_35 = arith.constant dense<0.000000e+00> : vector<4x8x8xf32>
    %84 = tpu.matmul %71, %83, %cst_35 {dimension_numbers = #tpu.dot_dimension_numbers<[0], [2], [2], [1], [0, 1, 0, 2, 1, 1], [1], [0]>} : vector<8x4x8xf32>, vector<4x8x8xf32>, vector<4x8x8xf32> -> vector<4x8x8xf32>
    %85 = tpu.transpose %84, [2, 0, 1] : vector<4x8x8xf32> -> vector<8x4x8xf32>
    "tpu.trace_stop"() : () -> ()
    %86 = vector.shape_cast %85 : vector<8x4x8xf32> to vector<8x32xf32>
    %c0_36 = arith.constant 0 : index
    %c0_37 = arith.constant 0 : index
    %c0_38 = arith.constant 0 : index
    %87 = vector.load %arg5[%c0_36, %c0_37, %c0_38] : memref<2x32x32xf32, #tpu.memory_space<vmem>>, vector<1x32x32xf32>
    %88 = vector.shape_cast %87 : vector<1x32x32xf32> to vector<32x32xf32>
    %cst_39 = arith.constant dense<0.000000e+00> : vector<8x32xf32>
    %89 = tpu.matmul %86, %88, %cst_39 {dimension_numbers = #tpu.dot_dimension_numbers<[1], [0], [0], [1], [0, 0, 1, 1], [], []>} : vector<8x32xf32>, vector<32x32xf32>, vector<8x32xf32> -> vector<8x32xf32>
    %c0_40 = arith.constant 0 : index
    %c3 = arith.constant 3 : index
    %c0_41 = arith.constant 0 : index
    %90 = vector.load %arg9[%c0_40, %c3, %c0_41] : memref<2x10x128xf32, #tpu.memory_space<vmem>>, vector<1x1x32xf32>
    %91 = vector.shape_cast %90 : vector<1x1x32xf32> to vector<1x32xf32>
    %92 = vector.broadcast %91 : vector<1x32xf32> to vector<8x32xf32>
    %93 = arith.addf %89, %92 : vector<8x32xf32>
    %94 = arith.addf %40, %93 : vector<8x32xf32>
    %c0_42 = arith.constant 0 : index
    %c4 = arith.constant 4 : index
    %c0_43 = arith.constant 0 : index
    %95 = vector.load %arg9[%c0_42, %c4, %c0_43] : memref<2x10x128xf32, #tpu.memory_space<vmem>>, vector<1x1x32xf32>
    %96 = vector.shape_cast %95 : vector<1x1x32xf32> to vector<1x32xf32>
    %c0_44 = arith.constant 0 : index
    %c5 = arith.constant 5 : index
    %c0_45 = arith.constant 0 : index
    %97 = vector.load %arg9[%c0_44, %c5, %c0_45] : memref<2x10x128xf32, #tpu.memory_space<vmem>>, vector<1x1x32xf32>
    %98 = vector.shape_cast %97 : vector<1x1x32xf32> to vector<1x32xf32>
    %cst_46 = arith.constant dense<0.000000e+00> : vector<8xf32>
    %99 = vector.multi_reduction <add>, %94, %cst_46 [1] : vector<8x32xf32> to vector<8xf32>
    %100 = vector.shape_cast %99 : vector<8xf32> to vector<8x1xf32>
    %cst_47 = arith.constant 3.200000e+01 : f32
    %101 = vector.broadcast %cst_47 : f32 to vector<8x1xf32>
    %102 = arith.divf %100, %101 : vector<8x1xf32>
    %103 = arith.mulf %94, %94 : vector<8x32xf32>
    %cst_48 = arith.constant dense<0.000000e+00> : vector<8xf32>
    %104 = vector.multi_reduction <add>, %103, %cst_48 [1] : vector<8x32xf32> to vector<8xf32>
    %105 = vector.shape_cast %104 : vector<8xf32> to vector<8x1xf32>
    %cst_49 = arith.constant 3.200000e+01 : f32
    %106 = vector.broadcast %cst_49 : f32 to vector<8x1xf32>
    %107 = arith.divf %105, %106 : vector<8x1xf32>
    %108 = arith.mulf %102, %102 : vector<8x1xf32>
    %109 = arith.subf %107, %108 : vector<8x1xf32>
    %cst_50 = arith.constant 0.000000e+00 : f32
    %110 = vector.broadcast %cst_50 : f32 to vector<8x1xf32>
    %111 = arith.maximumf %109, %110 : vector<8x1xf32>
    %112 = vector.broadcast %102 : vector<8x1xf32> to vector<8x32xf32>
    %113 = arith.subf %94, %112 : vector<8x32xf32>
    %cst_51 = arith.constant 9.99999996E-13 : f32
    %114 = vector.broadcast %cst_51 : f32 to vector<8x1xf32>
    %115 = arith.addf %111, %114 : vector<8x1xf32>
    %116 = math.rsqrt %115 : vector<8x1xf32>
    %117 = vector.broadcast %116 : vector<8x1xf32> to vector<8x32xf32>
    %118 = arith.mulf %113, %117 : vector<8x32xf32>
    %119 = vector.broadcast %96 : vector<1x32xf32> to vector<8x32xf32>
    %120 = arith.mulf %118, %119 : vector<8x32xf32>
    %121 = vector.broadcast %98 : vector<1x32xf32> to vector<8x32xf32>
    %122 = arith.addf %120, %121 : vector<8x32xf32>
    %c0_52 = arith.constant 0 : index
    %c0_53 = arith.constant 0 : index
    %c0_54 = arith.constant 0 : index
    %123 = vector.load %arg6[%c0_52, %c0_53, %c0_54] : memref<2x32x64xf32, #tpu.memory_space<vmem>>, vector<1x32x64xf32>
    %124 = vector.shape_cast %123 : vector<1x32x64xf32> to vector<32x64xf32>
    %cst_55 = arith.constant dense<0.000000e+00> : vector<8x64xf32>
    %125 = tpu.matmul %122, %124, %cst_55 {dimension_numbers = #tpu.dot_dimension_numbers<[1], [0], [0], [1], [0, 0, 1, 1], [], []>} : vector<8x32xf32>, vector<32x64xf32>, vector<8x64xf32> -> vector<8x64xf32>
    %c0_56 = arith.constant 0 : index
    %c6 = arith.constant 6 : index
    %c0_57 = arith.constant 0 : index
    %126 = vector.load %arg9[%c0_56, %c6, %c0_57] : memref<2x10x128xf32, #tpu.memory_space<vmem>>, vector<1x1x64xf32>
    %127 = vector.shape_cast %126 : vector<1x1x64xf32> to vector<1x64xf32>
    %128 = vector.broadcast %127 : vector<1x64xf32> to vector<8x64xf32>
    %129 = arith.addf %125, %128 : vector<8x64xf32>
    %cst_58 = arith.constant 5.000000e-01 : f32
    %130 = vector.broadcast %cst_58 : f32 to vector<8x64xf32>
    %131 = arith.mulf %130, %129 : vector<8x64xf32>
    %cst_59 = arith.constant 4.471500e-02 : f32
    %132 = vector.broadcast %cst_59 : f32 to vector<8x64xf32>
    %133 = arith.mulf %132, %129 : vector<8x64xf32>
    %134 = arith.mulf %133, %129 : vector<8x64xf32>
    %135 = arith.mulf %134, %129 : vector<8x64xf32>
    %136 = arith.addf %129, %135 : vector<8x64xf32>
    %cst_60 = arith.constant 0.797884583 : f32
    %137 = vector.broadcast %cst_60 : f32 to vector<8x64xf32>
    %138 = arith.mulf %137, %136 : vector<8x64xf32>
    %139 = math.tanh %138 : vector<8x64xf32>
    %cst_61 = arith.constant 1.000000e+00 : f32
    %140 = vector.broadcast %cst_61 : f32 to vector<8x64xf32>
    %141 = arith.addf %140, %139 : vector<8x64xf32>
    %142 = arith.mulf %131, %141 : vector<8x64xf32>
    %c0_62 = arith.constant 0 : index
    %c0_63 = arith.constant 0 : index
    %c0_64 = arith.constant 0 : index
    %143 = vector.load %arg7[%c0_62, %c0_63, %c0_64] : memref<2x64x32xf32, #tpu.memory_space<vmem>>, vector<1x64x32xf32>
    %144 = vector.shape_cast %143 : vector<1x64x32xf32> to vector<64x32xf32>
    %cst_65 = arith.constant dense<0.000000e+00> : vector<8x32xf32>
    %145 = tpu.matmul %142, %144, %cst_65 {dimension_numbers = #tpu.dot_dimension_numbers<[1], [0], [0], [1], [0, 0, 1, 1], [], []>} : vector<8x64xf32>, vector<64x32xf32>, vector<8x32xf32> -> vector<8x32xf32>
    %c0_66 = arith.constant 0 : index
    %c7 = arith.constant 7 : index
    %c0_67 = arith.constant 0 : index
    %146 = vector.load %arg9[%c0_66, %c7, %c0_67] : memref<2x10x128xf32, #tpu.memory_space<vmem>>, vector<1x1x32xf32>
    %147 = vector.shape_cast %146 : vector<1x1x32xf32> to vector<1x32xf32>
    %148 = vector.broadcast %147 : vector<1x32xf32> to vector<8x32xf32>
    %149 = arith.addf %145, %148 : vector<8x32xf32>
    %150 = arith.addf %122, %149 : vector<8x32xf32>
    %c0_68 = arith.constant 0 : index
    %c8 = arith.constant 8 : index
    %c0_69 = arith.constant 0 : index
    %151 = vector.load %arg9[%c0_68, %c8, %c0_69] : memref<2x10x128xf32, #tpu.memory_space<vmem>>, vector<1x1x32xf32>
    %152 = vector.shape_cast %151 : vector<1x1x32xf32> to vector<1x32xf32>
    %c0_70 = arith.constant 0 : index
    %c9 = arith.constant 9 : index
    %c0_71 = arith.constant 0 : index
    %153 = vector.load %arg9[%c0_70, %c9, %c0_71] : memref<2x10x128xf32, #tpu.memory_space<vmem>>, vector<1x1x32xf32>
    %154 = vector.shape_cast %153 : vector<1x1x32xf32> to vector<1x32xf32>
    %cst_72 = arith.constant dense<0.000000e+00> : vector<8xf32>
    %155 = vector.multi_reduction <add>, %150, %cst_72 [1] : vector<8x32xf32> to vector<8xf32>
    %156 = vector.shape_cast %155 : vector<8xf32> to vector<8x1xf32>
    %cst_73 = arith.constant 3.200000e+01 : f32
    %157 = vector.broadcast %cst_73 : f32 to vector<8x1xf32>
    %158 = arith.divf %156, %157 : vector<8x1xf32>
    %159 = arith.mulf %150, %150 : vector<8x32xf32>
    %cst_74 = arith.constant dense<0.000000e+00> : vector<8xf32>
    %160 = vector.multi_reduction <add>, %159, %cst_74 [1] : vector<8x32xf32> to vector<8xf32>
    %161 = vector.shape_cast %160 : vector<8xf32> to vector<8x1xf32>
    %cst_75 = arith.constant 3.200000e+01 : f32
    %162 = vector.broadcast %cst_75 : f32 to vector<8x1xf32>
    %163 = arith.divf %161, %162 : vector<8x1xf32>
    %164 = arith.mulf %158, %158 : vector<8x1xf32>
    %165 = arith.subf %163, %164 : vector<8x1xf32>
    %cst_76 = arith.constant 0.000000e+00 : f32
    %166 = vector.broadcast %cst_76 : f32 to vector<8x1xf32>
    %167 = arith.maximumf %165, %166 : vector<8x1xf32>
    %168 = vector.broadcast %158 : vector<8x1xf32> to vector<8x32xf32>
    %169 = arith.subf %150, %168 : vector<8x32xf32>
    %cst_77 = arith.constant 9.99999996E-13 : f32
    %170 = vector.broadcast %cst_77 : f32 to vector<8x1xf32>
    %171 = arith.addf %167, %170 : vector<8x1xf32>
    %172 = math.rsqrt %171 : vector<8x1xf32>
    %173 = vector.broadcast %172 : vector<8x1xf32> to vector<8x32xf32>
    %174 = arith.mulf %169, %173 : vector<8x32xf32>
    %175 = vector.broadcast %152 : vector<1x32xf32> to vector<8x32xf32>
    %176 = arith.mulf %174, %175 : vector<8x32xf32>
    %177 = vector.broadcast %154 : vector<1x32xf32> to vector<8x32xf32>
    %178 = arith.addf %176, %177 : vector<8x32xf32>
    %c1_78 = arith.constant 1 : index
    %c0_79 = arith.constant 0 : index
    %c0_80 = arith.constant 0 : index
    %179 = vector.load %arg4[%c1_78, %c0_79, %c0_80] : memref<2x32x96xf32, #tpu.memory_space<vmem>>, vector<1x32x96xf32>
    %180 = vector.shape_cast %179 : vector<1x32x96xf32> to vector<32x96xf32>
    %cst_81 = arith.constant dense<0.000000e+00> : vector<8x96xf32>
    %181 = tpu.matmul %178, %180, %cst_81 {dimension_numbers = #tpu.dot_dimension_numbers<[1], [0], [0], [1], [0, 0, 1, 1], [], []>} : vector<8x32xf32>, vector<32x96xf32>, vector<8x96xf32> -> vector<8x96xf32>
    %182 = vector.extract_strided_slice %181 {offsets = [0, 0], sizes = [8, 32], strides = [1, 1]} : vector<8x96xf32> to vector<8x32xf32>
    %c1_82 = arith.constant 1 : index
    %c0_83 = arith.constant 0 : index
    %c0_84 = arith.constant 0 : index
    %183 = vector.load %arg9[%c1_82, %c0_83, %c0_84] : memref<2x10x128xf32, #tpu.memory_space<vmem>>, vector<1x1x32xf32>
    %184 = vector.shape_cast %183 : vector<1x1x32xf32> to vector<1x32xf32>
    %185 = vector.broadcast %184 : vector<1x32xf32> to vector<8x32xf32>
    %186 = arith.addf %182, %185 : vector<8x32xf32>
    %187 = vector.shape_cast %186 : vector<8x32xf32> to vector<8x4x8xf32>
    %188 = vector.extract_strided_slice %181 {offsets = [0, 32], sizes = [8, 32], strides = [1, 1]} : vector<8x96xf32> to vector<8x32xf32>
    %c1_85 = arith.constant 1 : index
    %c1_86 = arith.constant 1 : index
    %c0_87 = arith.constant 0 : index
    %189 = vector.load %arg9[%c1_85, %c1_86, %c0_87] : memref<2x10x128xf32, #tpu.memory_space<vmem>>, vector<1x1x32xf32>
    %190 = vector.shape_cast %189 : vector<1x1x32xf32> to vector<1x32xf32>
    %191 = vector.broadcast %190 : vector<1x32xf32> to vector<8x32xf32>
    %192 = arith.addf %188, %191 : vector<8x32xf32>
    %193 = vector.shape_cast %192 : vector<8x32xf32> to vector<8x4x8xf32>
    %194 = vector.extract_strided_slice %181 {offsets = [0, 64], sizes = [8, 32], strides = [1, 1]} : vector<8x96xf32> to vector<8x32xf32>
    %c1_88 = arith.constant 1 : index
    %c2_89 = arith.constant 2 : index
    %c0_90 = arith.constant 0 : index
    %195 = vector.load %arg9[%c1_88, %c2_89, %c0_90] : memref<2x10x128xf32, #tpu.memory_space<vmem>>, vector<1x1x32xf32>
    %196 = vector.shape_cast %195 : vector<1x1x32xf32> to vector<1x32xf32>
    %197 = vector.broadcast %196 : vector<1x32xf32> to vector<8x32xf32>
    %198 = arith.addf %194, %197 : vector<8x32xf32>
    %199 = vector.shape_cast %198 : vector<8x32xf32> to vector<8x4x8xf32>
    "tpu.trace_start"() <{level = 10 : i32, message = "qhd,khd->hqk"}> : () -> ()
    %cst_91 = arith.constant dense<0.000000e+00> : vector<4x8x8xf32>
    %200 = tpu.matmul %187, %193, %cst_91 {dimension_numbers = #tpu.dot_dimension_numbers<[2], [2], [0], [0], [0, 1, 0, 0, 1, 0], [1], [1]>} : vector<8x4x8xf32>, vector<8x4x8xf32>, vector<4x8x8xf32> -> vector<4x8x8xf32>
    "tpu.trace_stop"() : () -> ()
    %201 = arith.addf %200, %50 : vector<4x8x8xf32>
    %cst_92 = arith.constant dense<0xFF800000> : vector<4x8xf32>
    %202 = vector.multi_reduction <maximumf>, %201, %cst_92 [2] : vector<4x8x8xf32> to vector<4x8xf32>
    %203 = vector.shape_cast %202 : vector<4x8xf32> to vector<4x8x1xf32>
    %204 = vector.broadcast %203 : vector<4x8x1xf32> to vector<4x8x8xf32>
    %205 = arith.subf %201, %204 : vector<4x8x8xf32>
    %206 = math.exp %205 : vector<4x8x8xf32>
    %cst_93 = arith.constant dense<0.000000e+00> : vector<4x8xf32>
    %207 = vector.multi_reduction <add>, %206, %cst_93 [2] : vector<4x8x8xf32> to vector<4x8xf32>
    %208 = vector.shape_cast %207 : vector<4x8xf32> to vector<4x8x1xf32>
    %209 = tpu.reciprocal %208 {approx = true} : vector<4x8x1xf32> -> vector<4x8x1xf32>
    %210 = vector.broadcast %209 : vector<4x8x1xf32> to vector<4x8x8xf32>
    %211 = arith.mulf %206, %210 : vector<4x8x8xf32>
    "tpu.trace_start"() <{level = 10 : i32, message = "hqk,khd->qhd"}> : () -> ()
    %cst_94 = arith.constant dense<0.000000e+00> : vector<4x8x8xf32>
    %212 = tpu.matmul %199, %211, %cst_94 {dimension_numbers = #tpu.dot_dimension_numbers<[0], [2], [2], [1], [0, 1, 0, 2, 1, 1], [1], [0]>} : vector<8x4x8xf32>, vector<4x8x8xf32>, vector<4x8x8xf32> -> vector<4x8x8xf32>
    %213 = tpu.transpose %212, [2, 0, 1] : vector<4x8x8xf32> -> vector<8x4x8xf32>
    "tpu.trace_stop"() : () -> ()
    %214 = vector.shape_cast %213 : vector<8x4x8xf32> to vector<8x32xf32>
    %c1_95 = arith.constant 1 : index
    %c0_96 = arith.constant 0 : index
    %c0_97 = arith.constant 0 : index
    %215 = vector.load %arg5[%c1_95, %c0_96, %c0_97] : memref<2x32x32xf32, #tpu.memory_space<vmem>>, vector<1x32x32xf32>
    %216 = vector.shape_cast %215 : vector<1x32x32xf32> to vector<32x32xf32>
    %cst_98 = arith.constant dense<0.000000e+00> : vector<8x32xf32>
    %217 = tpu.matmul %214, %216, %cst_98 {dimension_numbers = #tpu.dot_dimension_numbers<[1], [0], [0], [1], [0, 0, 1, 1], [], []>} : vector<8x32xf32>, vector<32x32xf32>, vector<8x32xf32> -> vector<8x32xf32>
    %c1_99 = arith.constant 1 : index
    %c3_100 = arith.constant 3 : index
    %c0_101 = arith.constant 0 : index
    %218 = vector.load %arg9[%c1_99, %c3_100, %c0_101] : memref<2x10x128xf32, #tpu.memory_space<vmem>>, vector<1x1x32xf32>
    %219 = vector.shape_cast %218 : vector<1x1x32xf32> to vector<1x32xf32>
    %220 = vector.broadcast %219 : vector<1x32xf32> to vector<8x32xf32>
    %221 = arith.addf %217, %220 : vector<8x32xf32>
    %222 = arith.addf %178, %221 : vector<8x32xf32>
    %c1_102 = arith.constant 1 : index
    %c4_103 = arith.constant 4 : index
    %c0_104 = arith.constant 0 : index
    %223 = vector.load %arg9[%c1_102, %c4_103, %c0_104] : memref<2x10x128xf32, #tpu.memory_space<vmem>>, vector<1x1x32xf32>
    %224 = vector.shape_cast %223 : vector<1x1x32xf32> to vector<1x32xf32>
    %c1_105 = arith.constant 1 : index
    %c5_106 = arith.constant 5 : index
    %c0_107 = arith.constant 0 : index
    %225 = vector.load %arg9[%c1_105, %c5_106, %c0_107] : memref<2x10x128xf32, #tpu.memory_space<vmem>>, vector<1x1x32xf32>
    %226 = vector.shape_cast %225 : vector<1x1x32xf32> to vector<1x32xf32>
    %cst_108 = arith.constant dense<0.000000e+00> : vector<8xf32>
    %227 = vector.multi_reduction <add>, %222, %cst_108 [1] : vector<8x32xf32> to vector<8xf32>
    %228 = vector.shape_cast %227 : vector<8xf32> to vector<8x1xf32>
    %cst_109 = arith.constant 3.200000e+01 : f32
    %229 = vector.broadcast %cst_109 : f32 to vector<8x1xf32>
    %230 = arith.divf %228, %229 : vector<8x1xf32>
    %231 = arith.mulf %222, %222 : vector<8x32xf32>
    %cst_110 = arith.constant dense<0.000000e+00> : vector<8xf32>
    %232 = vector.multi_reduction <add>, %231, %cst_110 [1] : vector<8x32xf32> to vector<8xf32>
    %233 = vector.shape_cast %232 : vector<8xf32> to vector<8x1xf32>
    %cst_111 = arith.constant 3.200000e+01 : f32
    %234 = vector.broadcast %cst_111 : f32 to vector<8x1xf32>
    %235 = arith.divf %233, %234 : vector<8x1xf32>
    %236 = arith.mulf %230, %230 : vector<8x1xf32>
    %237 = arith.subf %235, %236 : vector<8x1xf32>
    %cst_112 = arith.constant 0.000000e+00 : f32
    %238 = vector.broadcast %cst_112 : f32 to vector<8x1xf32>
    %239 = arith.maximumf %237, %238 : vector<8x1xf32>
    %240 = vector.broadcast %230 : vector<8x1xf32> to vector<8x32xf32>
    %241 = arith.subf %222, %240 : vector<8x32xf32>
    %cst_113 = arith.constant 9.99999996E-13 : f32
    %242 = vector.broadcast %cst_113 : f32 to vector<8x1xf32>
    %243 = arith.addf %239, %242 : vector<8x1xf32>
    %244 = math.rsqrt %243 : vector<8x1xf32>
    %245 = vector.broadcast %244 : vector<8x1xf32> to vector<8x32xf32>
    %246 = arith.mulf %241, %245 : vector<8x32xf32>
    %247 = vector.broadcast %224 : vector<1x32xf32> to vector<8x32xf32>
    %248 = arith.mulf %246, %247 : vector<8x32xf32>
    %249 = vector.broadcast %226 : vector<1x32xf32> to vector<8x32xf32>
    %250 = arith.addf %248, %249 : vector<8x32xf32>
    %c1_114 = arith.constant 1 : index
    %c0_115 = arith.constant 0 : index
    %c0_116 = arith.constant 0 : index
    %251 = vector.load %arg6[%c1_114, %c0_115, %c0_116] : memref<2x32x64xf32, #tpu.memory_space<vmem>>, vector<1x32x64xf32>
    %252 = vector.shape_cast %251 : vector<1x32x64xf32> to vector<32x64xf32>
    %cst_117 = arith.constant dense<0.000000e+00> : vector<8x64xf32>
    %253 = tpu.matmul %250, %252, %cst_117 {dimension_numbers = #tpu.dot_dimension_numbers<[1], [0], [0], [1], [0, 0, 1, 1], [], []>} : vector<8x32xf32>, vector<32x64xf32>, vector<8x64xf32> -> vector<8x64xf32>
    %c1_118 = arith.constant 1 : index
    %c6_119 = arith.constant 6 : index
    %c0_120 = arith.constant 0 : index
    %254 = vector.load %arg9[%c1_118, %c6_119, %c0_120] : memref<2x10x128xf32, #tpu.memory_space<vmem>>, vector<1x1x64xf32>
    %255 = vector.shape_cast %254 : vector<1x1x64xf32> to vector<1x64xf32>
    %256 = vector.broadcast %255 : vector<1x64xf32> to vector<8x64xf32>
    %257 = arith.addf %253, %256 : vector<8x64xf32>
    %cst_121 = arith.constant 5.000000e-01 : f32
    %258 = vector.broadcast %cst_121 : f32 to vector<8x64xf32>
    %259 = arith.mulf %258, %257 : vector<8x64xf32>
    %cst_122 = arith.constant 4.471500e-02 : f32
    %260 = vector.broadcast %cst_122 : f32 to vector<8x64xf32>
    %261 = arith.mulf %260, %257 : vector<8x64xf32>
    %262 = arith.mulf %261, %257 : vector<8x64xf32>
    %263 = arith.mulf %262, %257 : vector<8x64xf32>
    %264 = arith.addf %257, %263 : vector<8x64xf32>
    %cst_123 = arith.constant 0.797884583 : f32
    %265 = vector.broadcast %cst_123 : f32 to vector<8x64xf32>
    %266 = arith.mulf %265, %264 : vector<8x64xf32>
    %267 = math.tanh %266 : vector<8x64xf32>
    %cst_124 = arith.constant 1.000000e+00 : f32
    %268 = vector.broadcast %cst_124 : f32 to vector<8x64xf32>
    %269 = arith.addf %268, %267 : vector<8x64xf32>
    %270 = arith.mulf %259, %269 : vector<8x64xf32>
    %c1_125 = arith.constant 1 : index
    %c0_126 = arith.constant 0 : index
    %c0_127 = arith.constant 0 : index
    %271 = vector.load %arg7[%c1_125, %c0_126, %c0_127] : memref<2x64x32xf32, #tpu.memory_space<vmem>>, vector<1x64x32xf32>
    %272 = vector.shape_cast %271 : vector<1x64x32xf32> to vector<64x32xf32>
    %cst_128 = arith.constant dense<0.000000e+00> : vector<8x32xf32>
    %273 = tpu.matmul %270, %272, %cst_128 {dimension_numbers = #tpu.dot_dimension_numbers<[1], [0], [0], [1], [0, 0, 1, 1], [], []>} : vector<8x64xf32>, vector<64x32xf32>, vector<8x32xf32> -> vector<8x32xf32>
    %c1_129 = arith.constant 1 : index
    %c7_130 = arith.constant 7 : index
    %c0_131 = arith.constant 0 : index
    %274 = vector.load %arg9[%c1_129, %c7_130, %c0_131] : memref<2x10x128xf32, #tpu.memory_space<vmem>>, vector<1x1x32xf32>
    %275 = vector.shape_cast %274 : vector<1x1x32xf32> to vector<1x32xf32>
    %276 = vector.broadcast %275 : vector<1x32xf32> to vector<8x32xf32>
    %277 = arith.addf %273, %276 : vector<8x32xf32>
    %278 = arith.addf %250, %277 : vector<8x32xf32>
    %c1_132 = arith.constant 1 : index
    %c8_133 = arith.constant 8 : index
    %c0_134 = arith.constant 0 : index
    %279 = vector.load %arg9[%c1_132, %c8_133, %c0_134] : memref<2x10x128xf32, #tpu.memory_space<vmem>>, vector<1x1x32xf32>
    %280 = vector.shape_cast %279 : vector<1x1x32xf32> to vector<1x32xf32>
    %c1_135 = arith.constant 1 : index
    %c9_136 = arith.constant 9 : index
    %c0_137 = arith.constant 0 : index
    %281 = vector.load %arg9[%c1_135, %c9_136, %c0_137] : memref<2x10x128xf32, #tpu.memory_space<vmem>>, vector<1x1x32xf32>
    %282 = vector.shape_cast %281 : vector<1x1x32xf32> to vector<1x32xf32>
    %cst_138 = arith.constant dense<0.000000e+00> : vector<8xf32>
    %283 = vector.multi_reduction <add>, %278, %cst_138 [1] : vector<8x32xf32> to vector<8xf32>
    %284 = vector.shape_cast %283 : vector<8xf32> to vector<8x1xf32>
    %cst_139 = arith.constant 3.200000e+01 : f32
    %285 = vector.broadcast %cst_139 : f32 to vector<8x1xf32>
    %286 = arith.divf %284, %285 : vector<8x1xf32>
    %287 = arith.mulf %278, %278 : vector<8x32xf32>
    %cst_140 = arith.constant dense<0.000000e+00> : vector<8xf32>
    %288 = vector.multi_reduction <add>, %287, %cst_140 [1] : vector<8x32xf32> to vector<8xf32>
    %289 = vector.shape_cast %288 : vector<8xf32> to vector<8x1xf32>
    %cst_141 = arith.constant 3.200000e+01 : f32
    %290 = vector.broadcast %cst_141 : f32 to vector<8x1xf32>
    %291 = arith.divf %289, %290 : vector<8x1xf32>
    %292 = arith.mulf %286, %286 : vector<8x1xf32>
    %293 = arith.subf %291, %292 : vector<8x1xf32>
    %cst_142 = arith.constant 0.000000e+00 : f32
    %294 = vector.broadcast %cst_142 : f32 to vector<8x1xf32>
    %295 = arith.maximumf %293, %294 : vector<8x1xf32>
    %296 = vector.broadcast %286 : vector<8x1xf32> to vector<8x32xf32>
    %297 = arith.subf %278, %296 : vector<8x32xf32>
    %cst_143 = arith.constant 9.99999996E-13 : f32
    %298 = vector.broadcast %cst_143 : f32 to vector<8x1xf32>
    %299 = arith.addf %295, %298 : vector<8x1xf32>
    %300 = math.rsqrt %299 : vector<8x1xf32>
    %301 = vector.broadcast %300 : vector<8x1xf32> to vector<8x32xf32>
    %302 = arith.mulf %297, %301 : vector<8x32xf32>
    %303 = vector.broadcast %280 : vector<1x32xf32> to vector<8x32xf32>
    %304 = arith.mulf %302, %303 : vector<8x32xf32>
    %305 = vector.broadcast %282 : vector<1x32xf32> to vector<8x32xf32>
    %306 = arith.addf %304, %305 : vector<8x32xf32>
    %307 = vector.extract_strided_slice %306 {offsets = [0, 0], sizes = [1, 32], strides = [1, 1]} : vector<8x32xf32> to vector<1x32xf32>
    %c0_144 = arith.constant 0 : index
    %c0_145 = arith.constant 0 : index
    %308 = vector.load %arg8[%c0_144, %c0_145] : memref<32x35xf32, #tpu.memory_space<vmem>>, vector<32x32xf32>
    %cst_146 = arith.constant dense<0.000000e+00> : vector<1x32xf32>
    %309 = tpu.matmul %307, %308, %cst_146 {dimension_numbers = #tpu.dot_dimension_numbers<[1], [0], [0], [1], [0, 0, 1, 1], [], []>} : vector<1x32xf32>, vector<32x32xf32>, vector<1x32xf32> -> vector<1x32xf32>
    %c2_147 = arith.constant 2 : index
    %c0_148 = arith.constant 0 : index
    %310 = vector.load %arg10[%c2_147, %c0_148] : memref<4x128xf32, #tpu.memory_space<vmem>>, vector<1x32xf32>
    %311 = arith.addf %309, %310 : vector<1x32xf32>
    %312 = math.tanh %311 : vector<1x32xf32>
    %c0_149 = arith.constant 0 : index
    %c32 = arith.constant 32 : index
    %313 = vector.load %arg8[%c0_149, %c32] : memref<32x35xf32, #tpu.memory_space<vmem>>, vector<32x3xf32>
    %cst_150 = arith.constant dense<0.000000e+00> : vector<1x3xf32>
    %314 = tpu.matmul %312, %313, %cst_150 {dimension_numbers = #tpu.dot_dimension_numbers<[1], [0], [0], [1], [0, 0, 1, 1], [], []>} : vector<1x32xf32>, vector<32x3xf32>, vector<1x3xf32> -> vector<1x3xf32>
    %c3_151 = arith.constant 3 : index
    %c0_152 = arith.constant 0 : index
    %315 = vector.load %arg10[%c3_151, %c0_152] : memref<4x128xf32, #tpu.memory_space<vmem>>, vector<1x3xf32>
    %316 = arith.addf %314, %315 : vector<1x3xf32>
    %317 = vector.shape_cast %316 : vector<1x3xf32> to vector<1x1x3xf32>
    %c0_153 = arith.constant 0 : index
    %c0_154 = arith.constant 0 : index
    %c0_155 = arith.constant 0 : index
    %318 = vector.load %arg11[%c0_153, %c0_154, %c0_155] : memref<1x1x3xf32, #tpu.memory_space<vmem>>, vector<1x1x3xf32>
    tpu.vector_store %arg11[%c0_153, %c0_154, %c0_155], %317 {strides = array<i32>} : memref<1x1x3xf32, #tpu.memory_space<vmem>>, vector<1x1x3xf32>,
    return
  }
  func.func @transform_0(%arg0: i32) -> (i32, i32, i32) {
    %c0_i32 = arith.constant 0 : i32
    %c0_i32_0 = arith.constant 0 : i32
    %c0_i32_1 = arith.constant 0 : i32
    return %arg0, %c0_i32, %c0_i32_0 : i32, i32, i32
  }
  func.func @transform_1(%arg0: i32) -> (i32, i32, i32) {
    %c0_i32 = arith.constant 0 : i32
    %c0_i32_0 = arith.constant 0 : i32
    %c0_i32_1 = arith.constant 0 : i32
    return %arg0, %c0_i32, %c0_i32_0 : i32, i32, i32
  }
  func.func @transform_2(%arg0: i32) -> (i32, i32) {
    %c0_i32 = arith.constant 0 : i32
    %c0_i32_0 = arith.constant 0 : i32
    %c0_i32_1 = arith.constant 0 : i32
    return %c0_i32, %c0_i32_0 : i32, i32
  }
  func.func @transform_3(%arg0: i32) -> (i32, i32, i32) {
    %c0_i32 = arith.constant 0 : i32
    %c0_i32_0 = arith.constant 0 : i32
    %c0_i32_1 = arith.constant 0 : i32
    %c0_i32_2 = arith.constant 0 : i32
    return %c0_i32, %c0_i32_0, %c0_i32_1 : i32, i32, i32
  }
  func.func @transform_4(%arg0: i32) -> (i32, i32, i32) {
    %c0_i32 = arith.constant 0 : i32
    %c0_i32_0 = arith.constant 0 : i32
    %c0_i32_1 = arith.constant 0 : i32
    %c0_i32_2 = arith.constant 0 : i32
    return %c0_i32, %c0_i32_0, %c0_i32_1 : i32, i32, i32
  }
  func.func @transform_5(%arg0: i32) -> (i32, i32, i32) {
    %c0_i32 = arith.constant 0 : i32
    %c0_i32_0 = arith.constant 0 : i32
    %c0_i32_1 = arith.constant 0 : i32
    %c0_i32_2 = arith.constant 0 : i32
    return %c0_i32, %c0_i32_0, %c0_i32_1 : i32, i32, i32
  }
  func.func @transform_6(%arg0: i32) -> (i32, i32, i32) {
    %c0_i32 = arith.constant 0 : i32
    %c0_i32_0 = arith.constant 0 : i32
    %c0_i32_1 = arith.constant 0 : i32
    %c0_i32_2 = arith.constant 0 : i32
    return %c0_i32, %c0_i32_0, %c0_i32_1 : i32, i32, i32
  }
  func.func @transform_7(%arg0: i32) -> (i32, i32) {
    %c0_i32 = arith.constant 0 : i32
    %c0_i32_0 = arith.constant 0 : i32
    %c0_i32_1 = arith.constant 0 : i32
    return %c0_i32, %c0_i32_0 : i32, i32
  }
  func.func @transform_8(%arg0: i32) -> (i32, i32, i32) {
    %c0_i32 = arith.constant 0 : i32
    %c0_i32_0 = arith.constant 0 : i32
    %c0_i32_1 = arith.constant 0 : i32
    %c0_i32_2 = arith.constant 0 : i32
    return %c0_i32, %c0_i32_0, %c0_i32_1 : i32, i32, i32
  }
  func.func @transform_9(%arg0: i32) -> (i32, i32) {
    %c0_i32 = arith.constant 0 : i32
    %c0_i32_0 = arith.constant 0 : i32
    %c0_i32_1 = arith.constant 0 : i32
    return %c0_i32, %c0_i32_0 : i32, i32
  }
  func.func @transform_10(%arg0: i32) -> (i32, i32, i32) {
    %c0_i32 = arith.constant 0 : i32
    %c0_i32_0 = arith.constant 0 : i32
    %c0_i32_1 = arith.constant 0 : i32
    return %arg0, %c0_i32, %c0_i32_0 : i32, i32, i32
  }
}

</mosaic_0001>

<bundles_post_ra>
// kernel: sentiment_classifier.1
= control target key start
LH: loop header
LB: loop body
LE: loop exit
PB: predicated region body
PF: predicated region fallthrough
CT: control target
= control target key end

     0   :  { %15 = vsyncpa [#allocation3], 0  ;;  %s5324_s0 = inlined_call_operand.vmem [shape: s32[2,1,8], index: 0, kind: input, shape index: {}]   ;;  %s5325_s1 = inlined_call_operand.vmem [shape: s32[2,1,8], index: 1, kind: input, shape index: {}]   ;;  %s5326_s2 = inlined_call_operand.vmem [shape: f32[82,32], index: 2, kind: input, shape index: {}]   ;;  %s5327_s3 = inlined_call_operand.vmem [shape: f32[2,32,96], index: 3, kind: input, shape index: {}]   ;;  %s5328_s4 = inlined_call_operand.vmem [shape: f32[2,32,32], index: 4, kind: input, shape index: {}]   ;;  %s5329_s5 = inlined_call_operand.vmem [shape: f32[2,32,64], index: 5, kind: input, shape index: {}]   ;;  %s5330_s6 = inlined_call_operand.vmem [shape: f32[2,64,32], index: 6, kind: input, shape index: {}]   ;;  %s5331_s7 = inlined_call_operand.vmem [shape: f32[32,35], index: 7, kind: input, shape index: {}]   ;;  %s5332_s8 = inlined_call_operand.vmem [shape: f32[2,10,128], index: 8, kind: input, shape index: {}]   ;;  %s5333_s9 = inlined_call_operand.vmem [shape: f32[4,128], index: 9, kind: input, shape index: {}]   ;;  %s5334_s10 = inlined_call_operand.hbm [shape: f32[2,1,3], index: 10, kind: output, shape index: {}]  }
   0x1   :  { %17 = vsyncpa [#allocation3 + $0x1], 0  ;;  %s4688_s13 = smov 0   ;;  %s4690_s14 = smov 0  }
   0x2   :  { %s4692_s15 = smov 0   ;;  %s4694_s16 = smov 0  }
   0x3 LB: > { %s4709_s17 = sadd.s32 4294967295, %s4617_s16   ;;  %s4032_s18 = sadd.s32 4294967294, %s4617_s16   ;;  %s4617_s16 = sphi %s4694_s16, %s5355_s16   ;;  %s4613_s15 = sphi %s4692_s15, %s5354_s15   ;;  %s4609_s14 = sphi %s4690_s14, %s5353_s14   ;;  %s4605_s13 = sphi %s4688_s13, %s5352_s13  }
   0x4   : > { %s4713_s19 = sadd.s32 1, %s4617_s16   ;;  %s250_s20 = sadd.s32 1, %s4613_s15 }
   0x5   : > { %s247_s21 = ssub.s32 %s4617_s16, %s4713_s19  ;;  %p260_p0 = scmp.ne.s32.totalorder %s4613_s15, %s4609_s14 }
   0x6   : > { %p248_p1 = scmp.eq.s32.totalorder %s247_s21, 0  ;;  %p261_p2 = scmp.eq.s32.totalorder %s4709_s17, 1 }
   0x7   : > { %p266_p3 = scmp.ne.s32.totalorder %s4609_s14, %s4605_s13  ;;  %p267_p4 = scmp.eq.s32.totalorder %s4032_s18, 1 }
   0x8   : > { %s4724_s22 = scalar_select %p248_p1, %s4613_s15, %s250_s20  }
   0x9   : > { %p4726_p5 = por %p261_p2, %p260_p0  ;;  %p4730_p6 = por %p267_p4, %p266_p3 }
   0xa   : > { %p4035_p7 = scmp.ge.s32.totalorder %s4617_s16, 1  ;;  %p321_p8 = scmp.lt.s32.totalorder %s4617_s16, 3 }
   0xc   : > { %p322_p9 = pnand %p4035_p7, %p321_p8 }
   0xd   : > { %p359_p10 = scmp.lt.s32.totalorder (!%p322_p9), %s4709_s17, 1  ;;  %s4621_s30 = smov (!%p322_p9), 32  }
   0xe   : > { %325 = sbr.rel (%p322_p9) target bundleno = 6023 (0x1787), region = 60  ;;  %s5342_s21 = smov (!%p322_p9), 112  }
   0xf   : > { %s4624_s25 = smov (!%p322_p9), 104   ;;  %s5338_s12 = smov (!%p322_p9), 64  }
  0x10   : > { %s5337_s11 = smov (!%p322_p9), 16   ;;  %s5335_s18 = smov (!%p322_p9), 24  }
  0x11   : > { %s5347_s27 = smov (!%p322_p9), 96  }
  0x13   : > { %v385_v0 = vld [vmem:[%s5326_s2 + $0x38] sm:$0xff]  ;;  %v4619_v1 = vmov 0.0   ;;  %v384_v2 = vld [vmem:[%s5326_s2 + $0x30] sm:$0xff]  ;;  %vm4620_vm0 = vmmov 0   ;;  %s360_s29 = scalar_select %p359_p10, %s4709_s17, 1  ;;  %v373_v3 = vlaneseq  ;;  %v383_v4 = vld [vmem:[%s5326_s2 + $0x28] sm:$0xff] }
  0x14   : > { %4232 = vmatprep.subr.mxu0 %v4619_v1  ;;  %4248 = vmatprep.mubr.msk.f32.mxu0 %vm4620_vm0, %v4619_v1  ;;  %v382_v8 = vld [vmem:[%s5326_s2 + $0x20] sm:$0xff]  ;;  %v381_v10 = vld [vmem:[%s5326_s2 + $0x18] sm:$0xff]  ;;  %v380_v13 = vld [vmem:[%s5326_s2 + $0x10] sm:$0xff]  ;;  %vm388_vm1 = vcmask 523264   ;;  %vm469_vm3 = vcmask 261120   ;;  %vm771_vm4 = vcmask 64512  }
  0x15   : > { %4233 = vmatpush3.msra.mxu0 %v385_v0  ;;  %4251 = vmatprep.subr.mxu1 %v4619_v1  ;;  %s361_s20 = scalar_lea.vmem %s5324_s0, %s360_s29  ;;  %s364_s26 = scalar_lea.vmem %s5325_s1, %s360_s29  ;;  %v4760_v5 = vshrl.u32 %v373_v3, 7  ;;  %v379_v15 = vld [vmem:[%s5326_s2 + $0x8] sm:$0xff]  ;;  %v378_v17 = vld [vmem:[%s5326_s2] sm:$0xff]  ;;  %v374_v18 = vand.u32 127, %v373_v3  ;;  %v4039_v22 = vld [vmem:[%s5326_s2 + $0x50] ss:$0 sm:$0xff] }
  0x16   : > { %4234 = vmatprep.subr.mxu0 %v4619_v1  ;;  %4259 = vmatprep.mubr.msk.f32.mxu1 %vm4620_vm0, %v4619_v1  ;;  %v4036_v6 = vld [vmem:[%s361_s20] ss:$0 sm:$0xff]  ;;  %v510_v30 = vld [vmem:[%s5327_s3 + $0x18] sm:$0xff]  ;;  %v509_v31 = vld [vmem:[%s5327_s3 + $0x10] sm:$0xff]  ;;  %s4622_s20 = smov 120   ;;  %s5336_s29 = smov 8  }
  0x17   : > { %4235 = vmatpush3.msra.mxu0 %v384_v2  ;;  %v497_v7 = vld [vmem:[%s364_s26] sm:$0x1]  ;;  %371 = vbcast.lane.b32.xlu0 %v4036_v6, 256  ;;  %v504_v12 = vsub.s32 0, %v4760_v5  ;;  %v508_v32 = vld [vmem:[%s5327_s3 + $0x8] sm:$0xff]  ;;  %s5340_s26 = smov 96  }
  0x18   : > { %4236 = vmatprep.subr.mxu0 %v4619_v1  ;;  %v498_v9 = vcvt.s32.f32 %v497_v7  ;;  %v386_v21 = vld [vmem:[%s5326_s2 + $0x40] sm:$0xff]  ;;  %4252 = vmatpush3.msra.mxu1 %v510_v30  ;;  %vm1825_vm5 = vcmask 130048   ;;  %vm1827_vm6 = vcmask 195584   ;;  %vm3956_vm7 = vcmask 16384  }
  0x19   : > { %4237 = vmatpush3.msra.mxu0 %v383_v4  ;;  %4253 = vmatprep.subr.mxu1 %v4619_v1  ;;  %v507_v33 = vld [vmem:[%s5327_s3] sm:$0xff] }
  0x1a   : > { %4238 = vmatprep.subr.mxu0 %v4619_v1  ;;  %v499_v11 = vsub.f32 1.0, %v498_v9  ;;  %4254 = vmatpush3.msra.mxu1 %v509_v31  ;;  %v4044_v34 = vld [vmem:[%s5332_s8 + $0x1] ss:$0 sm:$0xff]  ;;  %v4040_v45 = vld [vmem:[%s5333_s9] ss:$0 sm:$0xff] }
  0x1b   : > { %4239 = vmatpush3.msra.mxu0 %v382_v8  ;;  %4255 = vmatprep.subr.mxu1 %v4619_v1  ;;  %v4041_v47 = vld [vmem:[%s5333_s9 + $0x1] ss:$0 sm:$0xff]  ;;  %v4043_v56 = vld [vmem:[%s5332_s8] ss:$0 sm:$0xff]  ;;  %v4045_v0 = vld [vmem:[%s5332_s8 + $0x2] ss:$0 sm:$0xff] }
  0x1c   : > { %4240 = vmatprep.subr.mxu0 %v4619_v1  ;;  %v500_v14 = vmul.f32 -1e+09, %v499_v11  ;;  %4256 = vmatpush3.msra.mxu1 %v508_v32 }
  0x1d   : > { %4241 = vmatpush3.msra.mxu0 %v381_v10  ;;  %4257 = vmatprep.subr.mxu1 %v4619_v1 }
  0x1e   : > { %4242 = vmatprep.subr.mxu0 %v4619_v1  ;;  %v4779_v16 = vrot.slane %v500_v14, %v504_v12  ;;  %4258 = vmatpush3.msra.mxu1 %v507_v33 }
  0x1f   : > { %4243 = vmatpush3.msra.mxu0 %v380_v13  ;;  %4262 = vmatprep.subr.mxu1 %v4619_v1 }
  0x20   : > { %4244 = vmatprep.subr.mxu0 %v4619_v1 }
  0x21   : > { %4245 = vmatpush3.msra.mxu0 %v379_v15 }
  0x22   : > { %4246 = vmatprep.subr.mxu0 %v4619_v1 }
  0x23   : > { %4247 = vmatpush3.msra.mxu0 %v378_v17 }
  0x24   : > { %4272 = vmatprep.subr.mxu0 %v4619_v1 }
  0x89   : > { %v372_v19 = vpop.permute.xlu0 %371 }
  0x8a   : > { %vm375_vm2 = vcmp.eq.s32.totalorder %v374_v18, %v372_v19 }
  0x8b   : > { %v4037_v20 = vsel %vm375_vm2, 1.0, %v4619_v1 }
  0x8c   : > { %4249 = vmatmul.mubr.msk.f32.vlgmr.msra.gmra.mxu0 %vm388_vm1, %v4037_v20 }
  0x8d   : > { %4274 = vmatprep.mubr.msk.f32.mxu0 %vm4620_vm0, %v4619_v1 }
 0x14c   : > { %v458_v23 = vpop.f32.mrf.mxu0 }
 0x14d   : > { %v459_v24 = vadd.f32 %v458_v23, %v386_v21 }
 0x14e   : > { %v4250_v25 = vpop.f32.mrf.mxu0 }
 0x14f   : > { %v466_v26 = vadd.f32 %v4039_v22, %v459_v24 }
 0x151   : > { %v470_v27 = vsel %vm469_vm3, %v466_v26, 0.0  ;;  %v475_v28 = vmul.f32 %v466_v26, %v466_v26 }
 0x152   : > { %471 = vadd.xlane.f32.xlu0 %v470_v27 }
 0x153   : > { %v476_v29 = vsel %vm469_vm3, %v475_v28, 0.0 }
 0x154   : > { %477 = vadd.xlane.f32.xlu1 %v476_v29 }
 0x165   : > { %603 = vrot.lane.b32.xlu1 %v4044_v34, %s4621_s30 }
 0x1db   : > { %v472_v35 = vpop.xlane.xlu0 %471 }
 0x1dc   : > { %v474_v36 = vmul.f32 0.03125, %v472_v35 }
 0x1dd   : > { %v478_v37 = vpop.xlane.xlu1 %477 }
 0x1de   : > { %v480_v38 = vmul.f32 %v474_v36, %v474_v36  ;;  %v479_v39 = vmul.f32 0.03125, %v478_v37  ;;  %v483_v43 = vsub.f32 %v466_v26, %v474_v36 }
 0x1e0   : > { %v481_v40 = vsub.f32 %v479_v39, %v480_v38 }
 0x1e1   : > { %v604_v50 = vpop.permute.xlu1 %603 }
 0x1e2   : > { %v482_v41 = vmax.f32 %v481_v40, 0.0 }
 0x1e4   : > { %v484_v42 = vadd.f32 1e-12, %v482_v41 }
 0x1e6   : > { %4509 = vrsqrt.f32 %v484_v42 }
 0x1f3   : > { %v4510_v44 = vpop.eup %4509 }
 0x1f4   : > { %v486_v46 = vmul.f32 %v4510_v44, %v483_v43 }
 0x1f6   : > { %v491_v48 = vmul.f32 %v4040_v45, %v486_v46 }
 0x1f8   : > { %v4825_v49 = vadd.f32 %v4041_v47, %v491_v48 }
 0x1fa   : > { %4260 = vmatmul.mubr.msk.f32.vlgmr.msra.gmra.mxu1 %vm469_vm3, %v4825_v49 }
 0x1fb   : > { %4264 = vmatprep.mubr.msk.f32.mxu1 %vm4620_vm0, %v4619_v1 }
 0x2ba   : > { %v4831_v51 = vpop.f32.mrf.mxu1 }
 0x2bb   : > { %v606_v52 = vadd.f32 %v604_v50, %v4831_v51  ;;  %v589_v58 = vadd.f32 %v4043_v56, %v4831_v51 }
 0x2bc   : > { %v4261_v53 = vpop.f32.mrf.mxu1 }
 0x2bd   : > { %608 = vrot.lane.b32.xlu1 %v606_v52, %s4622_s20 }
 0x2c1   : > { %610 = vrot.lane.b32.xlu1 %v606_v52, %s5342_s21 }
 0x2c5   : > { %612 = vrot.lane.b32.xlu1 %v606_v52, %s4624_s25 }
 0x2c9   : > { %631 = vrot.lane.b32.xlu1 %v606_v52, %s5340_s26 }
 0x32f   : > { %v609_v54 = vpop.permute.xlu1 %608 }
 0x330   : > { %633 = vrot.lane.b32.xlu0 %v609_v54, %s5340_s26 }
 0x333   : > { %v611_v55 = vpop.permute.xlu1 %610 }
 0x334   : > { %635 = vrot.lane.b32.xlu1 %v611_v55, %s5340_s26 }
 0x337   : > { %v613_v57 = vpop.permute.xlu1 %612 }
 0x338   : > { %637 = vrot.lane.b32.xlu1 %v613_v57, %s5340_s26  ;;  %s5349_s26 = smov 16  }
 0x33b   : > { %v632_v59 = vpop.permute.xlu1 %631 }
 0x33c   : > { %591 = vrot.lane.b32.xlu1 %v589_v58, %s4622_s20 }
 0x340   : > { %593 = vrot.lane.b32.xlu1 %v589_v58, %s5342_s21 }
 0x344   : > { %595 = vrot.lane.b32.xlu1 %v589_v58, %s4624_s25 }
 0x34e   : > { %643 = vxpose.xlu0.b32.start.end [1/1] (short) (narrow) %v632_v59, 8 }
 0x3a2   : > { %v634_v60 = vpop.permute.xlu0 %633 }
 0x3a3   : > { %675 = vxpose.xlu1.b32.start.end [1/1] (short) (narrow) %v634_v60, 8 }
 0x3a6   : > { %v636_v61 = vpop.permute.xlu1 %635 }
 0x3a7   : > { %707 = vxpose.xlu0.b32.start.end [1/1] (short) (narrow) %v636_v61, 8 }
 0x3aa   : > { %v638_v62 = vpop.permute.xlu1 %637 }
 0x3ab   : > { %739 = vxpose.xlu0.b32.start.end [1/1] (short) (narrow) %v638_v62, 8 }
 0x3ae   : > { %v592_v2 = vpop.permute.xlu1 %591 }
 0x3b2   : > { %v594_v3 = vpop.permute.xlu1 %593 }
 0x3b6   : > { %v596_v4 = vpop.permute.xlu1 %595 }
 0x3ca   : > { %v659_v63 = vpop.trf.xlu0 }
 0x3cb   : > { %4263 = vmatpush3.msra.mxu1 %v659_v63 }
 0x3cc   : > { %4265 = vmatmul.mubr.msk.f32.vlgmr.msra.gmra.mxu1 %vm771_vm4, %v589_v58  ;;  %4267 = vmatprep.subr.mxu1 %v4619_v1 }
 0x3cd   : > { %4269 = vmatprep.mubr.msk.f32.mxu1 %vm4620_vm0, %v4619_v1 }
 0x3d4   : > { %620 = vrot.lane.b32.xlu0 %v4045_v0, %s5338_s12 }
 0x41f   : > { %v691_v6 = vpop.trf.xlu1 }
 0x420   : > { %4268 = vmatpush3.msra.mxu1 %v691_v6 }
 0x421   : > { %4270 = vmatmul.mubr.msk.f32.vlgmr.msra.gmra.mxu1 %vm771_vm4, %v592_v2  ;;  %4277 = vmatprep.subr.mxu1 %v4619_v1 }
 0x422   : > { %4279 = vmatprep.mubr.msk.f32.mxu1 %vm4620_vm0, %v4619_v1 }
 0x423   : > { %v723_v7 = vpop.trf.xlu0 }
 0x424   : > { %4273 = vmatpush3.msra.mxu0 %v723_v7 }
 0x425   : > { %4275 = vmatmul.mubr.msk.f32.vlgmr.msra.gmra.mxu0 %vm771_vm4, %v594_v3  ;;  %4282 = vmatprep.subr.mxu0 %v4619_v1 }
 0x426   : > { %4284 = vmatprep.mubr.msk.f32.mxu0 %vm4620_vm0, %v4619_v1 }
 0x427   : > { %v755_v8 = vpop.trf.xlu0 }
 0x428   : > { %4278 = vmatpush3.msra.mxu1 %v755_v8 }
 0x429   : > { %4280 = vmatmul.mubr.msk.f32.vlgmr.msra.gmra.mxu1 %vm771_vm4, %v596_v4  ;;  %4287 = vmatprep.subr.mxu1 %v4619_v1 }
 0x42a   : > { %4289 = vmatprep.mubr.msk.f32.mxu1 %vm4620_vm0, %v4619_v1 }
 0x446   : > { %v621_v13 = vpop.permute.xlu0 %620 }
 0x447   : > { %v623_v14 = vadd.f32 %v621_v13, %v4831_v51 }
 0x48c   : > { %v840_v9 = vpop.f32.mrf.mxu1 }
 0x48d   : > { %v841_v10 = vadd.f32 %v840_v9, %v4779_v16 }
 0x48e   : > { %v4266_v11 = vpop.f32.mrf.mxu1 }
 0x48f   : > { %v1060_v12 = vsel %vm771_vm4, %v841_v10, -inf }
 0x490   : > { %1061 = vmax.xlane.f32.xlu1 %v1060_v12 }
 0x4a1   : > { %625 = vrot.lane.b32.xlu1 %v623_v14, %s4622_s20 }
 0x4a5   : > { %627 = vrot.lane.b32.xlu1 %v623_v14, %s5342_s21 }
 0x4e1   : > { %v912_v15 = vpop.f32.mrf.mxu1 }
 0x4e2   : > { %v913_v17 = vadd.f32 %v912_v15, %v4779_v16 }
 0x4e3   : > { %v4271_v18 = vpop.f32.mrf.mxu1 }
 0x4e4   : > { %v1063_v19 = vsel %vm771_vm4, %v913_v17, -inf }
 0x4e5   : > { %1064 = vmax.xlane.f32.xlu0 %v1063_v19  ;;  %v984_v20 = vpop.f32.mrf.mxu0  ;;  %v1832_v19 = vld [vmem:[%s5328_s4 + $0x18] sm:$0xff] }
 0x4e6   : > { %v985_v21 = vadd.f32 %v984_v20, %v4779_v16 }
 0x4e7   : > { %v4276_v22 = vpop.f32.mrf.mxu0 }
 0x4e8   : > { %v1066_v23 = vsel %vm771_vm4, %v985_v21, -inf }
 0x4e9   : > { %v1056_v24 = vpop.f32.mrf.mxu1  ;;  %1067 = vmax.xlane.f32.xlu1 %v1066_v23  ;;  %v4628_v23 = vmov 1934713408  }
 0x4ea   : > { %v1057_v25 = vadd.f32 %v1056_v24, %v4779_v16  ;;  %v1711_v24 = vunpack.c.l.s4 %v4628_v23 }
 0x4eb   : > { %v4281_v26 = vpop.f32.mrf.mxu1 }
 0x4ec   : > { %v1069_v27 = vsel %vm771_vm4, %v1057_v25, -inf }
 0x4ed   : > { %1070 = vmax.xlane.f32.xlu1 %v1069_v27 }
 0x4fb   : > { %1104 = vrot.lane.b32.xlu0 %v623_v14, %s5338_s12 }
 0x4fe   : > { %629 = vrot.lane.b32.xlu1 %v623_v14, %s4624_s25 }
 0x519   : > { %v1062_v28 = vpop.xlane.xlu1 %1061 }
 0x51a   : > { %v1072_v31 = vsub.f32 %v841_v10, %v1062_v28  ;;  %v1712_v28 = vunpack.c.0.s8 %v1711_v24  ;;  %v1943_v24 = vld [vmem:[%s5329_s5 + $0x18] sm:$0xff] }
 0x51c   : > { %v1076_v32 = vmul.f32 1.442695, %v1072_v31 }
 0x51d   : > { %v626_v29 = vpop.permute.xlu1 %625 }
 0x51e   : > { %1106 = vrot.lane.b32.xlu1 %v626_v29, %s5338_s12  ;;  %4511 = vpow2.f32 %v1076_v32 }
 0x521   : > { %v628_v30 = vpop.permute.xlu1 %627 }
 0x522   : > { %1108 = vrot.lane.b32.xlu1 %v628_v30, %s5338_s12 }
 0x52b   : > { %v4512_v33 = vpop.eup %4511 }
 0x52c   : > { %v1084_v34 = vsel %vm771_vm4, %v4512_v33, 0.0 }
 0x546   : > { %1085 = vadd.xlane.f32.xlu1 %v1084_v34 }
 0x56e   : > { %v1065_v40 = vpop.xlane.xlu0 %1064 }
 0x56f   : > { %v1073_v41 = vsub.f32 %v913_v17, %v1065_v40 }
 0x571   : > { %v1078_v43 = vmul.f32 1.442695, %v1073_v41 }
 0x572   : > { %v1068_v35 = vpop.xlane.xlu1 %1067  ;;  %v1105_v53 = vpop.permute.xlu0 %1104 }
 0x573   : > { %v1074_v36 = vsub.f32 %v985_v21, %v1068_v35  ;;  %v4627_v21 = vmov 1983009808   ;;  %v4916_v35 = vsub.s32 %v1712_v28, %v4760_v5 }
 0x574   : > { %v1679_v22 = vunpack.c.l.s4 %v4627_v21 }
 0x575   : > { %v1080_v37 = vmul.f32 1.442695, %v1074_v36 }
 0x576   : > { %v1071_v38 = vpop.xlane.xlu1 %1070  ;;  %v1680_v26 = vunpack.c.0.s8 %v1679_v22 }
 0x577   : > { %4513 = vpow2.f32 %v1080_v37  ;;  %v1075_v44 = vsub.f32 %v1057_v25, %v1071_v38 }
 0x578   : > { %4515 = vpow2.f32 %v1078_v43  ;;  %v4913_v29 = vsub.s32 %v1680_v26, %v4760_v5  ;;  %v1830_v5 = vld [vmem:[%s5328_s4 + $0x8] sm:$0xff]  ;;  %v1940_v26 = vld [vmem:[%s5329_s5] sm:$0xff] }
 0x579   : > { %v1082_v46 = vmul.f32 1.442695, %v1075_v44  ;;  %v1831_v44 = vld [vmem:[%s5328_s4 + $0x10] sm:$0xff] }
 0x57a   : > { %v630_v39 = vpop.permute.xlu1 %629 }
 0x57b   : > { %1110 = vrot.lane.b32.xlu0 %v630_v39, %s5338_s12  ;;  %4517 = vpow2.f32 %v1082_v46 }
 0x584   : > { %v4514_v42 = vpop.eup %4513 }
 0x585   : > { %v1090_v45 = vsel %vm771_vm4, %v4514_v42, 0.0  ;;  %v4516_v47 = vpop.eup %4515 }
 0x586   : > { %1091 = vadd.xlane.f32.xlu1 %v1090_v45  ;;  %v1087_v48 = vsel %vm771_vm4, %v4516_v47, 0.0 }
 0x588   : > { %v4518_v50 = vpop.eup %4517 }
 0x589   : > { %v1093_v51 = vsel %vm771_vm4, %v4518_v50, 0.0 }
 0x590   : > { %v1107_v52 = vpop.permute.xlu1 %1106 }
 0x594   : > { %v1109_v54 = vpop.permute.xlu1 %1108 }
 0x59a   : > { %1088 = vadd.xlane.f32.xlu0 %v1087_v48 }
 0x59e   : > { %1094 = vadd.xlane.f32.xlu0 %v1093_v51 }
 0x5b9   : > { %1116 = vxpose.xlu1.b32.start.end [1/1] (short) (narrow) %v1105_v53, 8 }
 0x5bd   : > { %1180 = vxpose.xlu1.b32.start.end [1/1] (short) (narrow) %v1109_v54, 8  ;;  %v1829_v54 = vld [vmem:[%s5328_s4] sm:$0xff] }
 0x5cb   : > { %1148 = vxpose.xlu0.b32.start.end [1/1] (short) (narrow) %v1107_v52, 8 }
 0x5cf   : > { %v1086_v55 = vpop.xlane.xlu1 %1085 }
 0x5d0   : > { %4519 = vrcp.f32 %v1086_v55 }
 0x5dd   : > { %v4520_v56 = vpop.eup %4519 }
 0x5de   : > { %v1100_v57 = vmul.f32 %v4520_v56, %v4512_v33 }
 0x5e0   : > { %4283 = vmatpush3.xpose.msk.msra.mxu0 %vm771_vm4, %v1100_v57 }
 0x5e1   : > { %4292 = vmatprep.subr.mxu0 %v4619_v1 }
 0x5ed   : > { %v1111_v58 = vpop.permute.xlu0 %1110 }
 0x5ee   : > { %1212 = vxpose.xlu0.b32.start.end [1/1] (short) (narrow) %v1111_v58, 8 }
 0x60f   : > { %v1092_v59 = vpop.xlane.xlu1 %1091 }
 0x623   : > { %v1089_v60 = vpop.xlane.xlu0 %1088 }
 0x624   : > { %4521 = vrcp.f32 %v1089_v60 }
 0x625   : > { %4523 = vrcp.f32 %v1092_v59 }
 0x627   : > { %v1095_v0 = vpop.xlane.xlu0 %1094 }
 0x628   : > { %4525 = vrcp.f32 %v1095_v0 }
 0x631   : > { %v4522_v61 = vpop.eup %4521 }
 0x632   : > { %v4524_v62 = vpop.eup %4523  ;;  %v1101_v63 = vmul.f32 %v4522_v61, %v4516_v47 }
 0x633   : > { %v1102_v3 = vmul.f32 %v4524_v62, %v4514_v42 }
 0x634   : > { %4288 = vmatpush3.xpose.msk.msra.mxu1 %vm771_vm4, %v1101_v63 }
 0x635   : > { %v1132_v2 = vpop.trf.xlu1  ;;  %4297 = vmatprep.subr.mxu1 %v4619_v1  ;;  %v4526_v6 = vpop.eup %4525 }
 0x636   : > { %4285 = vmatmul.mubr.msk.f32.vlgmr.msra.gmra.mxu0 %vm771_vm4, %v1132_v2  ;;  %v1103_v8 = vmul.f32 %v4526_v6, %v4518_v50 }
 0x637   : > { %4293 = vmatpush3.xpose.msk.msra.mxu0 %vm771_vm4, %v1102_v3  ;;  %4294 = vmatprep.mubr.msk.f32.mxu0 %vm4620_vm0, %v4619_v1 }
 0x638   : > { %4302 = vmatprep.subr.mxu0 %v4619_v1 }
 0x639   : > { %v1196_v4 = vpop.trf.xlu1 }
 0x63a   : > { %4295 = vmatmul.mubr.msk.f32.vlgmr.msra.gmra.mxu0 %vm771_vm4, %v1196_v4 }
 0x63b   : > { %4310 = vmatprep.mubr.msk.f32.mxu0 %vm4620_vm0, %v4619_v1  ;;  %4303 = vmatpush3.msra.mxu0 %v1832_v19 }
 0x63c   : > { %4304 = vmatprep.subr.mxu0 %v4619_v1 }
 0x63d   : > { %4305 = vmatpush3.msra.mxu0 %v1831_v44  ;;  %v2038_v44 = vld [vmem:[%s5330_s6 + $0x38] sm:$0xff] }
 0x63e   : > { %4306 = vmatprep.subr.mxu0 %v4619_v1 }
 0x63f   : > { %4307 = vmatpush3.msra.mxu0 %v1830_v5  ;;  %v2037_v5 = vld [vmem:[%s5330_s6 + $0x30] sm:$0xff] }
 0x640   : > { %4308 = vmatprep.subr.mxu0 %v4619_v1 }
 0x641   : > { %4309 = vmatpush3.msra.mxu0 %v1829_v54 }
 0x642   : > { %4324 = vmatprep.subr.mxu0 %v4619_v1 }
 0x647   : > { %v1164_v7 = vpop.trf.xlu0 }
 0x648   : > { %4290 = vmatmul.mubr.msk.f32.vlgmr.msra.gmra.mxu1 %vm771_vm4, %v1164_v7 }
 0x649   : > { %4298 = vmatpush3.xpose.msk.msra.mxu1 %vm771_vm4, %v1103_v8  ;;  %4299 = vmatprep.mubr.msk.f32.mxu1 %vm4620_vm0, %v4619_v1 }
 0x64a   : > { %4313 = vmatprep.subr.mxu1 %v4619_v1 }
 0x66a   : > { %v1228_v9 = vpop.trf.xlu0 }
 0x66b   : > { %4300 = vmatmul.mubr.msk.f32.vlgmr.msra.gmra.mxu1 %vm771_vm4, %v1228_v9 }
 0x66c   : > { %4321 = vmatprep.mubr.msk.f32.mxu1 %vm4620_vm0, %v4619_v1  ;;  %4314 = vmatpush3.msra.mxu1 %v1943_v24 }
 0x66d   : > { %4315 = vmatprep.subr.mxu1 %v4619_v1 }
 0x6f6   : > { %v1316_v10 = vpop.f32.mrf.mxu0 }
 0x6f7   : > { %1548 = vxpose.xlu1.b32.start.end [1/1] (short) (narrow) %v1316_v10, 8 }
 0x6f8   : > { %v4286_v11 = vpop.f32.mrf.mxu0 }
 0x6fa   : > { %v1468_v12 = vpop.f32.mrf.mxu0 }
 0x6fb   : > { %1612 = vxpose.xlu1.b32.start.end [1/1] (short) (narrow) %v1468_v12, 8 }
 0x6fc   : > { %v4296_v13 = vpop.f32.mrf.mxu0 }
 0x708   : > { %v1392_v14 = vpop.f32.mrf.mxu1 }
 0x709   : > { %1580 = vxpose.xlu0.b32.start.end [1/1] (short) (narrow) %v1392_v14, 8 }
 0x70a   : > { %v4291_v15 = vpop.f32.mrf.mxu1 }
 0x70b   : > { %v4060_v15 = vld [vmem:[%s5332_s8 + $0x3] ss:$0 sm:$0xff] }
 0x72b   : > { %v1544_v17 = vpop.f32.mrf.mxu1 }
 0x72c   : > { %1644 = vxpose.xlu0.b32.start.end [1/1] (short) (narrow) %v1544_v17, 8 }
 0x72d   : > { %v4301_v18 = vpop.f32.mrf.mxu1 }
 0x773   : > { %v1564_v20 = vpop.trf.xlu1 }
 0x777   : > { %v1628_v27 = vpop.trf.xlu1 }
 0x778   : > { %v1676_v30 = vcombine.low %v1564_v20, %v1628_v27  ;;  %v1677_v31 = vcombine.high %v1564_v20, %v1628_v27 }
 0x77a   : > { %v1684_v36 = vrot.slane %v1676_v30, %v4913_v29  ;;  %v1691_v37 = vrot.slane %v1677_v31, %v4913_v29 }
 0x785   : > { %v1596_v25 = vpop.trf.xlu0 }
 0x7a8   : > { %v1660_v32 = vpop.trf.xlu0 }
 0x7a9   : > { %v1692_v33 = vcombine.low %v1596_v25, %v1660_v32  ;;  %v1693_v34 = vcombine.high %v1596_v25, %v1660_v32  ;;  %v1942_v25 = vld [vmem:[%s5329_s5 + $0x10] sm:$0xff] }
 0x7aa   : > { %4316 = vmatpush3.msra.mxu1 %v1942_v25 }
 0x7ab   : > { %v1700_v38 = vrot.slane %v1692_v33, %v4913_v29  ;;  %v1707_v39 = vrot.slane %v1693_v34, %v4913_v29  ;;  %4317 = vmatprep.subr.mxu1 %v4619_v1 }
 0x7ad   : > { %v1708_v40 = vcombine.low %v1684_v36, %v1700_v38  ;;  %v1709_v41 = vcombine.high %v1684_v36, %v1700_v38  ;;  %v1724_v42 = vcombine.low %v1691_v37, %v1707_v39  ;;  %v1725_v43 = vcombine.high %v1691_v37, %v1707_v39  ;;  %v4062_v39 = vld [vmem:[%s5332_s8 + $0x4] ss:$0 sm:$0xff] }
 0x7af   : > { %v1716_v45 = vrot.slane %v1708_v40, %v4916_v35  ;;  %v1723_v46 = vrot.slane %v1709_v41, %v4916_v35  ;;  %v1732_v47 = vrot.slane %v1724_v42, %v4916_v35  ;;  %v1739_v48 = vrot.slane %v1725_v43, %v4916_v35  ;;  %v4063_v41 = vld [vmem:[%s5332_s8 + $0x5] ss:$0 sm:$0xff] }
 0x7b1   : > { %v1744_v50 = vcombine.low %v1716_v45, %v1723_v46  ;;  %v4058_v51 = vcombine.high %v1716_v45, %v1723_v46  ;;  %v1760_v52 = vcombine.low %v1732_v47, %v1739_v48  ;;  %v4059_v53 = vcombine.high %v1732_v47, %v1739_v48  ;;  %v2036_v45 = vld [vmem:[%s5330_s6 + $0x28] sm:$0xff]  ;;  %v2035_v46 = vld [vmem:[%s5330_s6 + $0x20] sm:$0xff]  ;;  %v2034_v47 = vld [vmem:[%s5330_s6 + $0x18] sm:$0xff] }
 0x7b2   : > { %v2033_v48 = vld [vmem:[%s5330_s6 + $0x10] sm:$0xff] }
 0x7b3   : > { %v1751_v55 = vrot.slane %v1744_v50, %v4913_v29  ;;  %v1759_v56 = vrot.slane %v4058_v51, %v4913_v29  ;;  %v1767_v57 = vrot.slane %v1760_v52, %v4913_v29  ;;  %v1775_v58 = vrot.slane %v4059_v53, %v4913_v29  ;;  %v2032_v50 = vld [vmem:[%s5330_s6 + $0x8] sm:$0xff]  ;;  %v2031_v51 = vld [vmem:[%s5330_s6] sm:$0xff] }
 0x7b4   : > { %v4064_v52 = vld [vmem:[%s5332_s8 + $0x6] ss:$0 sm:$0xff] }
 0x7b5   : > { %v1777_v59 = vcombine.high %v1751_v55, %v1759_v56  ;;  %v1793_v60 = vcombine.high %v1767_v57, %v1775_v58  ;;  %v1776_v61 = vcombine.low %v1751_v55, %v1759_v56  ;;  %v1792_v62 = vcombine.low %v1767_v57, %v1775_v58 }
 0x7b7   : > { %v1791_v63 = vrot.slane %v1777_v59, %v4916_v35  ;;  %v1807_v0 = vrot.slane %v1793_v60, %v4916_v35  ;;  %v1784_v2 = vrot.slane %v1776_v61, %v4916_v35  ;;  %v1800_v3 = vrot.slane %v1792_v62, %v4916_v35 }
 0x7b9   : > { %v1810_v4 = vcombine.low %v1791_v63, %v1807_v0  ;;  %v1809_v6 = vcombine.high %v1784_v2, %v1800_v3  ;;  %v1808_v7 = vcombine.low %v1784_v2, %v1800_v3  ;;  %v1811_v8 = vcombine.high %v1791_v63, %v1807_v0  ;;  %v4066_v2 = vld [vmem:[%s5332_s8 + $0x7] ss:$0 sm:$0xff] }
 0x7bb   : > { %1817 = vrot.lane.b32.xlu0 %v1810_v4, %s5337_s11  ;;  %1813 = vrot.lane.b32.xlu1 %v1809_v6, %s5336_s29  ;;  %s5348_s11 = smov 64  }
 0x7bf   : > { %1821 = vrot.lane.b32.xlu1 %v1811_v8, %s5335_s18 }
 0x82d   : > { %v1814_v9 = vpop.permute.xlu1 %1813  ;;  %v1818_v10 = vpop.permute.xlu0 %1817 }
 0x82e   : > { %v1824_v11 = vsel %vm771_vm4, %v1808_v7, %v1814_v9 }
 0x82f   : > { %v1826_v13 = vsel %vm1825_vm5, %v1824_v11, %v1818_v10  ;;  %v4073_v11 = vld [vmem:[%s5327_s3 + $0x38] sm:$0xff] }
 0x831   : > { %v1822_v12 = vpop.permute.xlu1 %1821 }
 0x832   : > { %v1828_v14 = vsel %vm1827_vm6, %v1826_v13, %v1822_v12  ;;  %v4072_v12 = vld [vmem:[%s5327_s3 + $0x30] sm:$0xff]  ;;  %v4071_v13 = vld [vmem:[%s5327_s3 + $0x28] sm:$0xff] }
 0x833   : > { %4311 = vmatmul.mubr.msk.f32.vlgmr.msra.gmra.mxu0 %vm469_vm3, %v1828_v14  ;;  %v4070_v14 = vld [vmem:[%s5327_s3 + $0x20] sm:$0xff] }
 0x834   : > { %4340 = vmatprep.mubr.msk.f32.mxu0 %vm4620_vm0, %v4619_v1  ;;  %4325 = vmatpush3.msra.mxu0 %v2038_v44 }
 0x835   : > { %4326 = vmatprep.subr.mxu0 %v4619_v1 }
 0x836   : > { %4327 = vmatpush3.msra.mxu0 %v2037_v5 }
 0x837   : > { %4328 = vmatprep.subr.mxu0 %v4619_v1 }
 0x838   : > { %4329 = vmatpush3.msra.mxu0 %v2036_v45 }
 0x839   : > { %4330 = vmatprep.subr.mxu0 %v4619_v1 }
 0x83a   : > { %4331 = vmatpush3.msra.mxu0 %v2035_v46  ;;  %v4080_v46 = vld [vmem:[%s5332_s8 + $0x12] ss:$0 sm:$0xff] }
 0x83b   : > { %4332 = vmatprep.subr.mxu0 %v4619_v1 }
 0x83c   : > { %4333 = vmatpush3.msra.mxu0 %v2034_v47 }
 0x83d   : > { %4334 = vmatprep.subr.mxu0 %v4619_v1 }
 0x83e   : > { %4335 = vmatpush3.msra.mxu0 %v2033_v48 }
 0x83f   : > { %4336 = vmatprep.subr.mxu0 %v4619_v1 }
 0x840   : > { %4337 = vmatpush3.msra.mxu0 %v2032_v50 }
 0x841   : > { %4338 = vmatprep.subr.mxu0 %v4619_v1 }
 0x842   : > { %4339 = vmatpush3.msra.mxu0 %v2031_v51 }
 0x843   : > { %4364 = vmatprep.subr.mxu0 %v4619_v1 }
 0x8f3   : > { %v1907_v17 = vpop.f32.mrf.mxu0 }
 0x8f4   : > { %v1908_v18 = vadd.f32 %v4060_v15, %v1907_v17  ;;  %v4078_v15 = vld [vmem:[%s5332_s8 + $0x11] ss:$0 sm:$0xff] }
 0x8f5   : > { %v4312_v19 = vpop.f32.mrf.mxu0 }
 0x8f6   : > { %v1911_v20 = vadd.f32 %v1908_v18, %v4825_v49  ;;  %v1941_v49 = vld [vmem:[%s5329_s5 + $0x8] sm:$0xff] }
 0x8f7   : > { %4318 = vmatpush3.msra.mxu1 %v1941_v49 }
 0x8f8   : > { %v1914_v21 = vsel %vm469_vm3, %v1911_v20, 0.0  ;;  %v1918_v22 = vmul.f32 %v1911_v20, %v1911_v20  ;;  %4319 = vmatprep.subr.mxu1 %v4619_v1 }
 0x8f9   : > { %1915 = vadd.xlane.f32.xlu1 %v1914_v21  ;;  %4320 = vmatpush3.msra.mxu1 %v1940_v26  ;;  %v4068_v26 = vld [vmem:[%s5332_s8 + $0x8] ss:$0 sm:$0xff] }
 0x8fa   : > { %v1919_v23 = vsel %vm469_vm3, %v1918_v22, 0.0  ;;  %4343 = vmatprep.subr.mxu1 %v4619_v1 }
 0x8fb   : > { %1920 = vadd.xlane.f32.xlu0 %v1919_v23 }
 0x911   : > { %2244 = vrot.lane.b32.xlu0 %v4078_v15, %s4621_s30  ;;  %s5346_s30 = smov 112  }
 0x982   : > { %v1916_v27 = vpop.xlane.xlu1 %1915 }
 0x983   : > { %v1917_v28 = vmul.f32 0.03125, %v1916_v27 }
 0x984   : > { %v1921_v30 = vpop.xlane.xlu0 %1920 }
 0x985   : > { %v1923_v31 = vmul.f32 %v1917_v28, %v1917_v28  ;;  %v1922_v32 = vmul.f32 0.03125, %v1921_v30  ;;  %v1926_v37 = vsub.f32 %v1911_v20, %v1917_v28  ;;  %v4069_v28 = vld [vmem:[%s5332_s8 + $0x9] ss:$0 sm:$0xff] }
 0x987   : > { %v1924_v33 = vsub.f32 %v1922_v32, %v1923_v31 }
 0x988   : > { %v2245_v32 = vpop.permute.xlu0 %2244 }
 0x989   : > { %v1925_v34 = vmax.f32 %v1924_v33, 0.0 }
 0x98b   : > { %v1927_v36 = vadd.f32 1e-12, %v1925_v34 }
 0x98d   : > { %4527 = vrsqrt.f32 %v1927_v36 }
 0x99a   : > { %v4528_v38 = vpop.eup %4527 }
 0x99b   : > { %v1929_v40 = vmul.f32 %v4528_v38, %v1926_v37  ;;  %v4076_v38 = vld [vmem:[%s5332_s8 + $0x10] ss:$0 sm:$0xff] }
 0x99d   : > { %v1934_v42 = vmul.f32 %v4062_v39, %v1929_v40 }
 0x99f   : > { %v1939_v43 = vadd.f32 %v4063_v41, %v1934_v42 }
 0x9a1   : > { %4322 = vmatmul.mubr.msk.f32.vlgmr.msra.gmra.mxu1 %vm469_vm3, %v1939_v43 }
 0x9a2   : > { %4351 = vmatprep.mubr.msk.f32.mxu1 %vm4620_vm0, %v4619_v1  ;;  %4344 = vmatpush3.msra.mxu1 %v4073_v11 }
 0x9a3   : > { %4345 = vmatprep.subr.mxu1 %v4619_v1 }
 0x9a4   : > { %4346 = vmatpush3.msra.mxu1 %v4072_v12 }
 0x9a5   : > { %4347 = vmatprep.subr.mxu1 %v4619_v1 }
 0x9a6   : > { %4348 = vmatpush3.msra.mxu1 %v4071_v13 }
 0x9a7   : > { %4349 = vmatprep.subr.mxu1 %v4619_v1 }
 0x9a8   : > { %4350 = vmatpush3.msra.mxu1 %v4070_v14 }
 0x9a9   : > { %4354 = vmatprep.subr.mxu1 %v4619_v1 }
 0xa61   : > { %v2018_v53 = vpop.f32.mrf.mxu1 }
 0xa62   : > { %v2019_v54 = vadd.f32 %v4064_v52, %v2018_v53 }
 0xa63   : > { %v4323_v55 = vpop.f32.mrf.mxu1 }
 0xa64   : > { %v2023_v56 = vmul.f32 0.044715, %v2019_v54  ;;  %v2022_v62 = vmul.f32 0.5, %v2019_v54 }
 0xa66   : > { %v2024_v57 = vmul.f32 %v2023_v56, %v2019_v54 }
 0xa68   : > { %v2025_v58 = vmul.f32 %v2024_v57, %v2019_v54 }
 0xa6a   : > { %v2026_v59 = vadd.f32 %v2025_v58, %v2019_v54 }
 0xa6c   : > { %v2027_v60 = vmul.f32 0.7978846, %v2026_v59 }
 0xa6e   : > { %4529 = vtanh.f32 %v2027_v60 }
 0xa7b   : > { %v4530_v61 = vpop.eup %4529 }
 0xa7c   : > { %v2029_v63 = vadd.f32 1.0, %v4530_v61 }
 0xa7e   : > { %v2030_v0 = vmul.f32 %v2029_v63, %v2022_v62 }
 0xa80   : > { %4341 = vmatmul.mubr.msk.f32.vlgmr.msra.gmra.mxu0 %vm388_vm1, %v2030_v0 }
 0xa81   : > { %4366 = vmatprep.mubr.msk.f32.mxu0 %vm4620_vm0, %v4619_v1 }
 0xb40   : > { %v2113_v3 = vpop.f32.mrf.mxu0 }
 0xb41   : > { %v2114_v4 = vadd.f32 %v4066_v2, %v2113_v3 }
 0xb42   : > { %v4342_v6 = vpop.f32.mrf.mxu0 }
 0xb43   : > { %v2117_v7 = vadd.f32 %v2114_v4, %v1939_v43 }
 0xb45   : > { %v2120_v8 = vsel %vm469_vm3, %v2117_v7, 0.0  ;;  %v2124_v9 = vmul.f32 %v2117_v7, %v2117_v7 }
 0xb46   : > { %2121 = vadd.xlane.f32.xlu1 %v2120_v8 }
 0xb47   : > { %v2125_v10 = vsel %vm469_vm3, %v2124_v9, 0.0 }
 0xb4a   : > { %2126 = vadd.xlane.f32.xlu1 %v2125_v10 }
 0xbcf   : > { %v2122_v17 = vpop.xlane.xlu1 %2121 }
 0xbd0   : > { %v2123_v18 = vmul.f32 0.03125, %v2122_v17 }
 0xbd2   : > { %v2129_v20 = vmul.f32 %v2123_v18, %v2123_v18  ;;  %v2132_v25 = vsub.f32 %v2117_v7, %v2123_v18 }
 0xbd3   : > { %v2127_v19 = vpop.xlane.xlu1 %2126 }
 0xbd4   : > { %v2128_v21 = vmul.f32 0.03125, %v2127_v19 }
 0xbd6   : > { %v2130_v22 = vsub.f32 %v2128_v21, %v2129_v20 }
 0xbd8   : > { %v2131_v23 = vmax.f32 %v2130_v22, 0.0 }
 0xbda   : > { %v2133_v24 = vadd.f32 1e-12, %v2131_v23 }
 0xbdc   : > { %4531 = vrsqrt.f32 %v2133_v24 }
 0xbe9   : > { %v4532_v49 = vpop.eup %4531 }
 0xbea   : > { %v2135_v27 = vmul.f32 %v4532_v49, %v2132_v25 }
 0xbec   : > { %v2140_v30 = vmul.f32 %v4068_v26, %v2135_v27 }
 0xbee   : > { %v5055_v31 = vadd.f32 %v4069_v28, %v2140_v30 }
 0xbf0   : > { %4352 = vmatmul.mubr.msk.f32.vlgmr.msra.gmra.mxu1 %vm469_vm3, %v5055_v31 }
 0xbf1   : > { %4356 = vmatprep.mubr.msk.f32.mxu1 %vm4620_vm0, %v4619_v1 }
 0xcb0   : > { %v2220_v33 = vpop.f32.mrf.mxu1 }
 0xcb1   : > { %v2247_v34 = vadd.f32 %v2245_v32, %v2220_v33  ;;  %v2230_v41 = vadd.f32 %v4076_v38, %v2220_v33 }
 0xcb2   : > { %v4353_v36 = vpop.f32.mrf.mxu1 }
 0xcb3   : > { %2253 = vrot.lane.b32.xlu0 %v2247_v34, %s4624_s25  ;;  %2249 = vrot.lane.b32.xlu1 %v2247_v34, %s4622_s20 }
 0xcb7   : > { %2251 = vrot.lane.b32.xlu1 %v2247_v34, %s5346_s30 }
 0xcbb   : > { %2272 = vrot.lane.b32.xlu1 %v2247_v34, %s5347_s27 }
 0xd25   : > { %v2250_v37 = vpop.permute.xlu1 %2249  ;;  %v2254_v39 = vpop.permute.xlu0 %2253 }
 0xd26   : > { %2274 = vrot.lane.b32.xlu0 %v2250_v37, %s5347_s27 }
 0xd29   : > { %v2252_v40 = vpop.permute.xlu1 %2251 }
 0xd2a   : > { %2278 = vrot.lane.b32.xlu0 %v2254_v39, %s5347_s27  ;;  %2276 = vrot.lane.b32.xlu1 %v2252_v40, %s5347_s27 }
 0xd2d   : > { %v2273_v42 = vpop.permute.xlu1 %2272 }
 0xd2e   : > { %2234 = vrot.lane.b32.xlu0 %v2230_v41, %s5346_s30  ;;  %2232 = vrot.lane.b32.xlu1 %v2230_v41, %s4622_s20 }
 0xd32   : > { %2236 = vrot.lane.b32.xlu1 %v2230_v41, %s4624_s25 }
 0xd4c   : > { %2284 = vxpose.xlu0.b32.start.end [1/1] (short) (narrow) %v2273_v42, 8 }
 0xd98   : > { %v2275_v43 = vpop.permute.xlu0 %2274 }
 0xd99   : > { %2316 = vxpose.xlu1.b32.start.end [1/1] (short) (narrow) %v2275_v43, 8 }
 0xd9c   : > { %v2277_v44 = vpop.permute.xlu1 %2276  ;;  %v2279_v5 = vpop.permute.xlu0 %2278 }
 0xd9d   : > { %2348 = vxpose.xlu0.b32.start.end [1/1] (short) (narrow) %v2277_v44, 8 }
 0xda0   : > { %v2235_v45 = vpop.permute.xlu0 %2234  ;;  %v2233_v48 = vpop.permute.xlu1 %2232 }
 0xda1   : > { %2380 = vxpose.xlu0.b32.start.end [1/1] (short) (narrow) %v2279_v5, 8 }
 0xda4   : > { %v2237_v50 = vpop.permute.xlu1 %2236 }
 0xdc8   : > { %v2300_v47 = vpop.trf.xlu0 }
 0xdc9   : > { %4355 = vmatpush3.msra.mxu1 %v2300_v47 }
 0xdca   : > { %2261 = vrot.lane.b32.xlu0 %v4080_v46, %s5348_s11  ;;  %4357 = vmatmul.mubr.msk.f32.vlgmr.msra.gmra.mxu1 %vm771_vm4, %v2230_v41 }
 0xdcb   : > { %4359 = vmatprep.subr.mxu1 %v4619_v1  ;;  %4361 = vmatprep.mubr.msk.f32.mxu1 %vm4620_vm0, %v4619_v1 }
 0xe15   : > { %v2332_v51 = vpop.trf.xlu1 }
 0xe16   : > { %4360 = vmatpush3.msra.mxu1 %v2332_v51 }
 0xe17   : > { %4362 = vmatmul.mubr.msk.f32.vlgmr.msra.gmra.mxu1 %vm771_vm4, %v2233_v48  ;;  %4369 = vmatprep.subr.mxu1 %v4619_v1 }
 0xe18   : > { %4371 = vmatprep.mubr.msk.f32.mxu1 %vm4620_vm0, %v4619_v1 }
 0xe19   : > { %v2364_v52 = vpop.trf.xlu0 }
 0xe1a   : > { %4365 = vmatpush3.msra.mxu0 %v2364_v52 }
 0xe1b   : > { %4367 = vmatmul.mubr.msk.f32.vlgmr.msra.gmra.mxu0 %vm771_vm4, %v2235_v45  ;;  %4374 = vmatprep.subr.mxu0 %v4619_v1 }
 0xe1c   : > { %4376 = vmatprep.mubr.msk.f32.mxu0 %vm4620_vm0, %v4619_v1 }
 0xe1d   : > { %v2396_v53 = vpop.trf.xlu0 }
 0xe1e   : > { %4370 = vmatpush3.msra.mxu1 %v2396_v53 }
 0xe1f   : > { %4372 = vmatmul.mubr.msk.f32.vlgmr.msra.gmra.mxu1 %vm771_vm4, %v2237_v50  ;;  %4379 = vmatprep.subr.mxu1 %v4619_v1 }
 0xe20   : > { %4381 = vmatprep.mubr.msk.f32.mxu1 %vm4620_vm0, %v4619_v1 }
 0xe3c   : > { %v2262_v58 = vpop.permute.xlu0 %2261 }
 0xe3d   : > { %v2264_v59 = vadd.f32 %v2262_v58, %v2220_v33 }
 0xe8a   : > { %v2480_v54 = vpop.f32.mrf.mxu1 }
 0xe8b   : > { %v2481_v55 = vadd.f32 %v2480_v54, %v4779_v16 }
 0xe8c   : > { %v4358_v56 = vpop.f32.mrf.mxu1 }
 0xe8d   : > { %v2700_v57 = vsel %vm771_vm4, %v2481_v55, -inf }
 0xe8e   : > { %2701 = vmax.xlane.f32.xlu1 %v2700_v57 }
 0xe9f   : > { %2266 = vrot.lane.b32.xlu1 %v2264_v59, %s4622_s20  ;;  %s5351_s20 = smov 24  }
 0xed7   : > { %v2552_v60 = vpop.f32.mrf.mxu1 }
 0xed8   : > { %v2553_v61 = vadd.f32 %v2552_v60, %v4779_v16 }
 0xed9   : > { %v4363_v62 = vpop.f32.mrf.mxu1 }
 0xeda   : > { %v2703_v63 = vsel %vm771_vm4, %v2553_v61, -inf }
 0xedb   : > { %2704 = vmax.xlane.f32.xlu0 %v2703_v63  ;;  %v2624_v0 = vpop.f32.mrf.mxu0  ;;  %v4098_v63 = vld [vmem:[%s5328_s4 + $0x38] sm:$0xff] }
 0xedc   : > { %v2625_v2 = vadd.f32 %v2624_v0, %v4779_v16 }
 0xedd   : > { %v4368_v3 = vpop.f32.mrf.mxu0 }
 0xede   : > { %v2706_v4 = vsel %vm771_vm4, %v2625_v2, -inf }
 0xedf   : > { %v2696_v6 = vpop.f32.mrf.mxu1  ;;  %2707 = vmax.xlane.f32.xlu1 %v2706_v4 }
 0xee0   : > { %v2697_v7 = vadd.f32 %v2696_v6, %v4779_v16 }
 0xee1   : > { %v4373_v8 = vpop.f32.mrf.mxu1 }
 0xee2   : > { %v2709_v9 = vsel %vm771_vm4, %v2697_v7, -inf }
 0xee3   : > { %2710 = vmax.xlane.f32.xlu1 %v2709_v9 }
 0xef1   : > { %2270 = vrot.lane.b32.xlu0 %v2264_v59, %s4624_s25  ;;  %s4130_s25 = sshll.u32 %s4709_s17, 4  ;;  %s4632_s17 = smov [#allocation2]  }
 0xef2   : > { %s5289_s28 = scalar_lea.hbm %s5334_s10, %s4130_s25 }
 0xef4   : > { %2268 = vrot.lane.b32.xlu1 %v2264_v59, %s5346_s30 }
 0xef8   : > { %2744 = vrot.lane.b32.xlu1 %v2264_v59, %s5348_s11 }
 0xf17   : > { %v2702_v10 = vpop.xlane.xlu1 %2701 }
 0xf18   : > { %v2712_v21 = vsub.f32 %v2481_v55, %v2702_v10 }
 0xf1a   : > { %v2716_v22 = vmul.f32 1.442695, %v2712_v21 }
 0xf1b   : > { %v2267_v11 = vpop.permute.xlu1 %2266 }
 0xf1c   : > { %2746 = vrot.lane.b32.xlu1 %v2267_v11, %s5348_s11 }
 0xf64   : > { %v2705_v12 = vpop.xlane.xlu0 %2704 }
 0xf65   : > { %v2713_v15 = vsub.f32 %v2553_v61, %v2705_v12 }
 0xf67   : > { %v2718_v18 = vmul.f32 1.442695, %v2713_v15 }
 0xf68   : > { %v2271_v13 = vpop.permute.xlu0 %2270  ;;  %v2708_v14 = vpop.xlane.xlu1 %2707 }
 0xf69   : > { %2750 = vrot.lane.b32.xlu0 %v2271_v13, %s5348_s11  ;;  %4533 = vpow2.f32 %v2718_v18  ;;  %v2714_v23 = vsub.f32 %v2625_v2, %v2708_v14  ;;  %v4097_v18 = vld [vmem:[%s5328_s4 + $0x30] sm:$0xff] }
 0xf6b   : > { %v2720_v25 = vmul.f32 1.442695, %v2714_v23 }
 0xf6c   : > { %v2711_v16 = vpop.xlane.xlu1 %2710 }
 0xf6d   : > { %v2715_v19 = vsub.f32 %v2697_v7, %v2711_v16 }
 0xf6f   : > { %v2722_v20 = vmul.f32 1.442695, %v2715_v19  ;;  %v4096_v19 = vld [vmem:[%s5328_s4 + $0x28] sm:$0xff] }
 0xf70   : > { %v2269_v17 = vpop.permute.xlu1 %2268 }
 0xf71   : > { %2748 = vrot.lane.b32.xlu1 %v2269_v17, %s5348_s11  ;;  %4535 = vpow2.f32 %v2722_v20  ;;  %s5350_s11 = smov 8  }
 0xf72   : > { %4537 = vpow2.f32 %v2716_v22 }
 0xf73   : > { %4539 = vpow2.f32 %v2720_v25 }
 0xf74   : > { %v2745_v34 = vpop.permute.xlu1 %2744 }
 0xf76   : > { %v4534_v24 = vpop.eup %4533 }
 0xf77   : > { %v2727_v49 = vsel %vm771_vm4, %v4534_v24, 0.0 }
 0xf7e   : > { %v4536_v26 = vpop.eup %4535 }
 0xf7f   : > { %v2733_v27 = vsel %vm771_vm4, %v4536_v26, 0.0  ;;  %v4538_v28 = vpop.eup %4537 }
 0xf80   : > { %v2724_v30 = vsel %vm771_vm4, %v4538_v28, 0.0  ;;  %v4540_v32 = vpop.eup %4539 }
 0xf81   : > { %v2730_v33 = vsel %vm771_vm4, %v4540_v32, 0.0 }
 0xf88   : > { %2728 = vadd.xlane.f32.xlu0 %v2727_v49 }
 0xf8c   : > { %2734 = vadd.xlane.f32.xlu0 %v2733_v27  ;;  %v4095_v27 = vld [vmem:[%s5328_s4 + $0x20] sm:$0xff] }
 0xf8e   : > { %v2747_v36 = vpop.permute.xlu1 %2746 }
 0xf95   : > { %2725 = vadd.xlane.f32.xlu1 %v2724_v30 }
 0xf99   : > { %2731 = vadd.xlane.f32.xlu1 %v2730_v33 }
 0xfb9   : > { %2788 = vxpose.xlu0.b32.start.end [1/1] (short) (narrow) %v2747_v36, 8 }
 0xfcc   : > { %2756 = vxpose.xlu1.b32.start.end [1/1] (short) (narrow) %v2745_v34, 8 }
 0xfdb   : > { %v2751_v37 = vpop.permute.xlu0 %2750 }
 0xfdc   : > { %2852 = vxpose.xlu0.b32.start.end [1/1] (short) (narrow) %v2751_v37, 8 }
 0xfe3   : > { %v2749_v38 = vpop.permute.xlu1 %2748 }
 0xfe4   : > { %2820 = vxpose.xlu1.b32.start.end [1/1] (short) (narrow) %v2749_v38, 8 }
0x1011   : > { %v2729_v39 = vpop.xlane.xlu0 %2728 }
0x1012   : > { %4541 = vrcp.f32 %v2729_v39 }
0x1015   : > { %v2735_v43 = vpop.xlane.xlu0 %2734 }
0x101e   : > { %v2726_v40 = vpop.xlane.xlu1 %2725 }
0x101f   : > { %v4542_v41 = vpop.eup %4541  ;;  %4543 = vrcp.f32 %v2726_v40 }
0x1020   : > { %v2741_v42 = vmul.f32 %v4542_v41, %v4534_v24  ;;  %4545 = vrcp.f32 %v2735_v43 }
0x1022   : > { %4380 = vmatpush3.xpose.msk.msra.mxu1 %vm771_vm4, %v2741_v42  ;;  %v2732_v46 = vpop.xlane.xlu1 %2731 }
0x1023   : > { %4389 = vmatprep.subr.mxu1 %v4619_v1  ;;  %4547 = vrcp.f32 %v2732_v46 }
0x102c   : > { %v4544_v44 = vpop.eup %4543 }
0x102d   : > { %v2740_v5 = vmul.f32 %v4544_v44, %v4538_v28  ;;  %v4546_v45 = vpop.eup %4545 }
0x102e   : > { %v2743_v48 = vmul.f32 %v4546_v45, %v4536_v26 }
0x102f   : > { %4375 = vmatpush3.xpose.msk.msra.mxu0 %vm771_vm4, %v2740_v5 }
0x1030   : > { %4384 = vmatprep.subr.mxu0 %v4619_v1  ;;  %v4548_v50 = vpop.eup %4547 }
0x1031   : > { %v2742_v52 = vmul.f32 %v4548_v50, %v4540_v32 }
0x1035   : > { %v2804_v47 = vpop.trf.xlu0 }
0x1036   : > { %4382 = vmatmul.mubr.msk.f32.vlgmr.msra.gmra.mxu1 %vm771_vm4, %v2804_v47 }
0x1037   : > { %4390 = vmatpush3.xpose.msk.msra.mxu1 %vm771_vm4, %v2743_v48  ;;  %4391 = vmatprep.mubr.msk.f32.mxu1 %vm4620_vm0, %v4619_v1 }
0x1038   : > { %4405 = vmatprep.subr.mxu1 %v4619_v1 }
0x1048   : > { %v2772_v51 = vpop.trf.xlu1 }
0x1049   : > { %4377 = vmatmul.mubr.msk.f32.vlgmr.msra.gmra.mxu0 %vm771_vm4, %v2772_v51 }
0x104a   : > { %4385 = vmatpush3.xpose.msk.msra.mxu0 %vm771_vm4, %v2742_v52  ;;  %4386 = vmatprep.mubr.msk.f32.mxu0 %vm4620_vm0, %v4619_v1 }
0x104b   : > { %4394 = vmatprep.subr.mxu0 %v4619_v1 }
0x1058   : > { %v2868_v53 = vpop.trf.xlu0 }
0x1059   : > { %4392 = vmatmul.mubr.msk.f32.vlgmr.msra.gmra.mxu1 %vm771_vm4, %v2868_v53 }
0x105a   : > { %4413 = vmatprep.mubr.msk.f32.mxu1 %vm4620_vm0, %v4619_v1 }
0x1060   : > { %v2836_v54 = vpop.trf.xlu1 }
0x1061   : > { %4387 = vmatmul.mubr.msk.f32.vlgmr.msra.gmra.mxu0 %vm771_vm4, %v2836_v54 }
0x1062   : > { %4402 = vmatprep.mubr.msk.f32.mxu0 %vm4620_vm0, %v4619_v1  ;;  %4395 = vmatpush3.msra.mxu0 %v4098_v63 }
0x1063   : > { %4396 = vmatprep.subr.mxu0 %v4619_v1 }
0x1064   : > { %4397 = vmatpush3.msra.mxu0 %v4097_v18  ;;  %v4117_v18 = vld [vmem:[%s5330_s6 + $0x60] sm:$0xff] }
0x1065   : > { %4398 = vmatprep.subr.mxu0 %v4619_v1 }
0x1066   : > { %4399 = vmatpush3.msra.mxu0 %v4096_v19  ;;  %v4116_v19 = vld [vmem:[%s5330_s6 + $0x58] sm:$0xff] }
0x1067   : > { %4400 = vmatprep.subr.mxu0 %v4619_v1 }
0x1068   : > { %4401 = vmatpush3.msra.mxu0 %v4095_v27 }
0x1069   : > { %4416 = vmatprep.subr.mxu0 %v4619_v1 }
0x10f6   : > { %v3032_v55 = vpop.f32.mrf.mxu1 }
0x10f7   : > { %3220 = vxpose.xlu0.b32.start.end [1/1] (short) (narrow) %v3032_v55, 8 }
0x10f8   : > { %v4383_v56 = vpop.f32.mrf.mxu1 }
0x1109   : > { %v2956_v57 = vpop.f32.mrf.mxu0 }
0x110a   : > { %3188 = vxpose.xlu1.b32.start.end [1/1] (short) (narrow) %v2956_v57, 8 }
0x110b   : > { %v4378_v58 = vpop.f32.mrf.mxu0 }
0x1119   : > { %v3184_v59 = vpop.f32.mrf.mxu1 }
0x111a   : > { %3284 = vxpose.xlu0.b32.start.end [1/1] (short) (narrow) %v3184_v59, 8  ;;  %v4109_v59 = vld [vmem:[%s5329_s5 + $0x38] sm:$0xff] }
0x111b   : > { %v4393_v60 = vpop.f32.mrf.mxu1  ;;  %4406 = vmatpush3.msra.mxu1 %v4109_v59 }
0x111c   : > { %v4108_v60 = vld [vmem:[%s5329_s5 + $0x30] sm:$0xff]  ;;  %4407 = vmatprep.subr.mxu1 %v4619_v1 }
0x111d   : > { %4408 = vmatpush3.msra.mxu1 %v4108_v60  ;;  %v4127_v60 = vld [vmem:[%s5332_s8 + $0x19] ss:$0 sm:$0xff] }
0x111e   : > { %4409 = vmatprep.subr.mxu1 %v4619_v1 }
0x1121   : > { %v3108_v61 = vpop.f32.mrf.mxu0 }
0x1122   : > { %3252 = vxpose.xlu1.b32.start.end [1/1] (short) (narrow) %v3108_v61, 8  ;;  %v4106_v61 = vld [vmem:[%s5329_s5 + $0x20] sm:$0xff] }
0x1123   : > { %v4388_v62 = vpop.f32.mrf.mxu0 }
0x1173   : > { %v3236_v0 = vpop.trf.xlu0 }
0x1186   : > { %v3204_v2 = vpop.trf.xlu1 }
0x1196   : > { %v3300_v3 = vpop.trf.xlu0 }
0x1197   : > { %v3332_v4 = vcombine.low %v3236_v0, %v3300_v3  ;;  %v3333_v6 = vcombine.high %v3236_v0, %v3300_v3 }
0x1199   : > { %v3340_v10 = vrot.slane %v3332_v4, %v4913_v29  ;;  %v3347_v11 = vrot.slane %v3333_v6, %v4913_v29 }
0x119e   : > { %v3268_v7 = vpop.trf.xlu1 }
0x119f   : > { %v3316_v8 = vcombine.low %v3204_v2, %v3268_v7  ;;  %v3317_v9 = vcombine.high %v3204_v2, %v3268_v7 }
0x11a1   : > { %v3324_v12 = vrot.slane %v3316_v8, %v4913_v29  ;;  %v3331_v13 = vrot.slane %v3317_v9, %v4913_v29 }
0x11a3   : > { %v3348_v14 = vcombine.low %v3324_v12, %v3340_v10  ;;  %v3349_v16 = vcombine.high %v3324_v12, %v3340_v10  ;;  %v3364_v15 = vcombine.low %v3331_v13, %v3347_v11  ;;  %v3365_v17 = vcombine.high %v3331_v13, %v3347_v11  ;;  %v4104_v10 = vld [vmem:[%s5332_s8 + $0x14] ss:$0 sm:$0xff]  ;;  %v4105_v12 = vld [vmem:[%s5332_s8 + $0x15] ss:$0 sm:$0xff] }
0x11a5   : > { %v3356_v20 = vrot.slane %v3348_v14, %v4916_v35  ;;  %v3363_v21 = vrot.slane %v3349_v16, %v4916_v35  ;;  %v3372_v22 = vrot.slane %v3364_v15, %v4916_v35  ;;  %v3379_v23 = vrot.slane %v3365_v17, %v4916_v35  ;;  %v4120_v16 = vld [vmem:[%s5330_s6 + $0x78] sm:$0xff]  ;;  %v4119_v15 = vld [vmem:[%s5330_s6 + $0x70] sm:$0xff]  ;;  %v4118_v17 = vld [vmem:[%s5330_s6 + $0x68] sm:$0xff] }
0x11a7   : > { %v3384_v24 = vcombine.low %v3356_v20, %v3363_v21  ;;  %v4093_v25 = vcombine.high %v3356_v20, %v3363_v21  ;;  %v3400_v49 = vcombine.low %v3372_v22, %v3379_v23  ;;  %v4094_v26 = vcombine.high %v3372_v22, %v3379_v23  ;;  %v4115_v20 = vld [vmem:[%s5330_s6 + $0x50] sm:$0xff]  ;;  %v4114_v21 = vld [vmem:[%s5330_s6 + $0x48] sm:$0xff]  ;;  %v4113_v22 = vld [vmem:[%s5330_s6 + $0x40] sm:$0xff] }
0x11a8   : > { %v4111_v23 = vld [vmem:[%s5332_s8 + $0x16] ss:$0 sm:$0xff] }
0x11a9   : > { %v3391_v28 = vrot.slane %v3384_v24, %v4913_v29  ;;  %v3399_v30 = vrot.slane %v4093_v25, %v4913_v29  ;;  %v3407_v32 = vrot.slane %v3400_v49, %v4913_v29  ;;  %v3415_v33 = vrot.slane %v4094_v26, %v4913_v29 }
0x11ab   : > { %v3417_v34 = vcombine.high %v3391_v28, %v3399_v30  ;;  %v3433_v36 = vcombine.high %v3407_v32, %v3415_v33  ;;  %v3416_v37 = vcombine.low %v3391_v28, %v3399_v30  ;;  %v3432_v38 = vcombine.low %v3407_v32, %v3415_v33 }
0x11ad   : > { %v3431_v39 = vrot.slane %v3417_v34, %v4916_v35  ;;  %v3447_v40 = vrot.slane %v3433_v36, %v4916_v35  ;;  %v3424_v41 = vrot.slane %v3416_v37, %v4916_v35  ;;  %v3440_v42 = vrot.slane %v3432_v38, %v4916_v35  ;;  %v4100_v35 = vld [vmem:[%s5332_s8 + $0x13] ss:$0 sm:$0xff]  ;;  %v4122_v38 = vld [vmem:[%s5332_s8 + $0x17] ss:$0 sm:$0xff] }
0x11af   : > { %v3450_v43 = vcombine.low %v3431_v39, %v3447_v40  ;;  %v3449_v44 = vcombine.high %v3424_v41, %v3440_v42  ;;  %v3448_v5 = vcombine.low %v3424_v41, %v3440_v42  ;;  %v3451_v29 = vcombine.high %v3431_v39, %v3447_v40 }
0x11b1   : > { %3457 = vrot.lane.b32.xlu0 %v3450_v43, %s5349_s26  ;;  %3453 = vrot.lane.b32.xlu1 %v3449_v44, %s5350_s11  ;;  %s357_s26 = sand.u32 1, %s4609_s14   ;;  %s4561_s11 = sshll.u32 %s4632_s17, 4  ;;  %s4562_s11 = int_to_ptr.vmem [resolvable:$false] %s4561_s11 }
0x11b2   : > { %s358_s29 = scalar_lea.vmem [#allocation2], %s357_s26  ;;  %s3959_s12 = scalar_lea.sflag [#allocation3], %s357_s26 }
0x11b3   : > { %s3971_s18 = sshll.u32 %s358_s29, 4  ;;  %s3972_s18 = int_to_ptr.vmem [resolvable:$true] %s3971_s18 }
0x11b4   : > { %s4557_s21 = scalar_lea.vmem %s3972_s18, 16  ;;  %p4564_p0 = scmp.lt.s32.totalorder %s3972_s18, %s4562_s11 }
0x11b5   : > { %3461 = vrot.lane.b32.xlu1 %v3451_v29, %s5351_s20  ;;  %v3790_v29 = vld [vmem:[%s5331_s7 + $0x18] sm:$0xff]  ;;  %p4558_p11 = scmp.ne.s32.totalorder %s3972_s18, %s4557_s21  ;;  %s4563_s20 = scalar_lea.vmem %s4562_s11, 32 }
0x11b6   : > { %p4565_p1 = scmp.lt.s32.totalorder %s4563_s20, %s4557_s21 }
0x11b7   : > { %p4559_p12 = pnand %p4558_p11, %p4726_p5 }
0x11b8   : > { %p4566_p2 = por %p4565_p1, %p4564_p0 }
0x11b9   : > { %p4560_p13 = pneg %p4559_p12 }
0x11bb   : > { %p4567_p3 = pnand %p4566_p2, %p4560_p13 }
0x1223   : > { %v3454_v45 = vpop.permute.xlu1 %3453  ;;  %v3458_v46 = vpop.permute.xlu0 %3457 }
0x1224   : > { %v3464_v47 = vsel %vm771_vm4, %v3448_v5, %v3454_v45  ;;  %v3789_v45 = vld [vmem:[%s5331_s7 + $0x10] sm:$0xff] }
0x1225   : > { %v3465_v50 = vsel %vm1825_vm5, %v3464_v47, %v3458_v46  ;;  %v3788_v46 = vld [vmem:[%s5331_s7 + $0x8] sm:$0xff]  ;;  %v3787_v47 = vld [vmem:[%s5331_s7] sm:$0xff] }
0x1227   : > { %v3462_v48 = vpop.permute.xlu1 %3461 }
0x1228   : > { %v3466_v51 = vsel %vm1827_vm6, %v3465_v50, %v3462_v48 }
0x1229   : > { %4403 = vmatmul.mubr.msk.f32.vlgmr.msra.gmra.mxu0 %vm469_vm3, %v3466_v51 }
0x122a   : > { %4432 = vmatprep.mubr.msk.f32.mxu0 %vm4620_vm0, %v4619_v1  ;;  %4417 = vmatpush3.msra.mxu0 %v4120_v16 }
0x122b   : > { %4418 = vmatprep.subr.mxu0 %v4619_v1 }
0x122c   : > { %4419 = vmatpush3.msra.mxu0 %v4119_v15 }
0x122d   : > { %4420 = vmatprep.subr.mxu0 %v4619_v1 }
0x122e   : > { %4421 = vmatpush3.msra.mxu0 %v4118_v17 }
0x122f   : > { %4422 = vmatprep.subr.mxu0 %v4619_v1 }
0x1230   : > { %4423 = vmatpush3.msra.mxu0 %v4117_v18 }
0x1231   : > { %4424 = vmatprep.subr.mxu0 %v4619_v1 }
0x1232   : > { %4425 = vmatpush3.msra.mxu0 %v4116_v19 }
0x1233   : > { %4426 = vmatprep.subr.mxu0 %v4619_v1 }
0x1234   : > { %4427 = vmatpush3.msra.mxu0 %v4115_v20 }
0x1235   : > { %4428 = vmatprep.subr.mxu0 %v4619_v1 }
0x1236   : > { %4429 = vmatpush3.msra.mxu0 %v4114_v21 }
0x1237   : > { %4430 = vmatprep.subr.mxu0 %v4619_v1 }
0x1238   : > { %4431 = vmatpush3.msra.mxu0 %v4113_v22 }
0x12e9   : > { %v3546_v52 = vpop.f32.mrf.mxu0 }
0x12ea   : > { %v3547_v53 = vadd.f32 %v4100_v35, %v3546_v52 }
0x12eb   : > { %v4404_v54 = vpop.f32.mrf.mxu0 }
0x12ec   : > { %v3550_v55 = vadd.f32 %v3547_v53, %v5055_v31  ;;  %v4107_v31 = vld [vmem:[%s5329_s5 + $0x28] sm:$0xff] }
0x12ed   : > { %4410 = vmatpush3.msra.mxu1 %v4107_v31 }
0x12ee   : > { %v3553_v56 = vsel %vm469_vm3, %v3550_v55, 0.0  ;;  %v3557_v57 = vmul.f32 %v3550_v55, %v3550_v55  ;;  %4411 = vmatprep.subr.mxu1 %v4619_v1 }
0x12ef   : > { %3554 = vadd.xlane.f32.xlu1 %v3553_v56  ;;  %4412 = vmatpush3.msra.mxu1 %v4106_v61 }
0x12f0   : > { %v3558_v58 = vsel %vm469_vm3, %v3557_v57, 0.0  ;;  %4435 = vmatprep.subr.mxu1 %v4619_v1 }
0x12f1   : > { %3559 = vadd.xlane.f32.xlu0 %v3558_v58  ;;  %v4126_v58 = vld [vmem:[%s5332_s8 + $0x18] ss:$0 sm:$0xff] }
0x1307   : > { %3877 = vrot.lane.b32.xlu0 %v3790_v29, %s5347_s27 }
0x130b   : > { %3871 = vrot.lane.b32.xlu0 %v3787_v47, %s5347_s27 }
0x1378   : > { %v3555_v62 = vpop.xlane.xlu1 %3554 }
0x1379   : > { %v3556_v63 = vmul.f32 0.03125, %v3555_v62 }
0x137a   : > { %v3560_v0 = vpop.xlane.xlu0 %3559 }
0x137b   : > { %v3562_v2 = vmul.f32 %v3556_v63, %v3556_v63  ;;  %v3561_v3 = vmul.f32 0.03125, %v3560_v0  ;;  %v3565_v8 = vsub.f32 %v3550_v55, %v3556_v63 }
0x137d   : > { %v3563_v4 = vsub.f32 %v3561_v3, %v3562_v2  ;;  %v3791_v3 = vld [vmem:[%s5333_s9 + $0x2] sm:$0x1] }
0x137e   : > { %v3878_v62 = vpop.permute.xlu0 %3877 }
0x137f   : > { %v3564_v6 = vmax.f32 %v3563_v4, 0.0 }
0x1381   : > { %v3566_v7 = vadd.f32 1e-12, %v3564_v6 }
0x1382   : > { %v3872_v2 = vpop.permute.xlu0 %3871 }
0x1383   : > { %4549 = vrsqrt.f32 %v3566_v7 }
0x1390   : > { %v4550_v9 = vpop.eup %4549 }
0x1391   : > { %v3568_v11 = vmul.f32 %v4550_v9, %v3565_v8  ;;  %v3866_v9 = vld [vmem:[%s5333_s9 + $0x3] sm:$0x1] }
0x1393   : > { %v3573_v13 = vmul.f32 %v4104_v10, %v3568_v11 }
0x1395   : > { %v3578_v14 = vadd.f32 %v4105_v12, %v3573_v13 }
0x1397   : > { %4414 = vmatmul.mubr.msk.f32.vlgmr.msra.gmra.mxu1 %vm469_vm3, %v3578_v14 }
0x1398   : > { %4443 = vmatprep.mubr.msk.f32.mxu1 %vm4620_vm0, %v4619_v1  ;;  %4436 = vmatpush3.msra.mxu1 %v3790_v29 }
0x1399   : > { %4437 = vmatprep.subr.mxu1 %v4619_v1 }
0x139a   : > { %4438 = vmatpush3.msra.mxu1 %v3789_v45 }
0x139b   : > { %4439 = vmatprep.subr.mxu1 %v4619_v1 }
0x139c   : > { %4440 = vmatpush3.msra.mxu1 %v3788_v46 }
0x139d   : > { %4441 = vmatprep.subr.mxu1 %v4619_v1 }
0x139e   : > { %4442 = vmatpush3.msra.mxu1 %v3787_v47 }
0x139f   : > { %4446 = vmatprep.subr.mxu1 %v4619_v1 }
0x1457   : > { %v3658_v24 = vpop.f32.mrf.mxu1 }
0x1458   : > { %v3659_v25 = vadd.f32 %v4111_v23, %v3658_v24 }
0x1459   : > { %v4415_v49 = vpop.f32.mrf.mxu1 }
0x145a   : > { %v3663_v26 = vmul.f32 0.044715, %v3659_v25  ;;  %v3662_v34 = vmul.f32 0.5, %v3659_v25 }
0x145c   : > { %v3664_v27 = vmul.f32 %v3663_v26, %v3659_v25 }
0x145e   : > { %v3665_v28 = vmul.f32 %v3664_v27, %v3659_v25 }
0x1460   : > { %v3666_v30 = vadd.f32 %v3665_v28, %v3659_v25 }
0x1462   : > { %v3667_v32 = vmul.f32 0.7978846, %v3666_v30 }
0x1464   : > { %4551 = vtanh.f32 %v3667_v32 }
0x1471   : > { %v4552_v33 = vpop.eup %4551 }
0x1472   : > { %v3669_v36 = vadd.f32 1.0, %v4552_v33 }
0x1474   : > { %v3670_v37 = vmul.f32 %v3669_v36, %v3662_v34 }
0x1476   : > { %4433 = vmatmul.mubr.msk.f32.vlgmr.msra.gmra.mxu0 %vm388_vm1, %v3670_v37 }
0x1536   : > { %v3754_v39 = vpop.f32.mrf.mxu0 }
0x1537   : > { %v3755_v40 = vadd.f32 %v4122_v38, %v3754_v39 }
0x1538   : > { %v4434_v41 = vpop.f32.mrf.mxu0 }
0x1539   : > { %v3758_v42 = vadd.f32 %v3755_v40, %v3578_v14 }
0x153b   : > { %v3761_v43 = vsel %vm469_vm3, %v3758_v42, 0.0  ;;  %v3765_v44 = vmul.f32 %v3758_v42, %v3758_v42 }
0x153c   : > { %3762 = vadd.xlane.f32.xlu1 %v3761_v43 }
0x153d   : > { %v3766_v5 = vsel %vm469_vm3, %v3765_v44, 0.0 }
0x1540   : > { %3767 = vadd.xlane.f32.xlu1 %v3766_v5 }
0x1551   : > { %3875 = vrot.lane.b32.xlu1 %v3789_v45, %s5347_s27 }
0x1555   : > { %3873 = vrot.lane.b32.xlu1 %v3788_v46, %s5347_s27 }
0x15c5   : > { %v3763_v48 = vpop.xlane.xlu1 %3762 }
0x15c6   : > { %v3764_v50 = vmul.f32 0.03125, %v3763_v48 }
0x15c8   : > { %v3770_v35 = vmul.f32 %v3764_v50, %v3764_v50  ;;  %v3773_v56 = vsub.f32 %v3758_v42, %v3764_v50 }
0x15c9   : > { %v3768_v51 = vpop.xlane.xlu1 %3767 }
0x15ca   : > { %v3769_v52 = vmul.f32 0.03125, %v3768_v51 }
0x15cc   : > { %v3771_v53 = vsub.f32 %v3769_v52, %v3770_v35 }
0x15cd   : > { %v3876_v63 = vpop.permute.xlu1 %3875 }
0x15ce   : > { %v3772_v54 = vmax.f32 %v3771_v53, 0.0 }
0x15d0   : > { %v3774_v55 = vadd.f32 1e-12, %v3772_v54 }
0x15d1   : > { %v3874_v0 = vpop.permute.xlu1 %3873 }
0x15d2   : > { %4553 = vrsqrt.f32 %v3774_v55 }
0x15df   : > { %v4554_v57 = vpop.eup %4553 }
0x15e0   : > { %v3776_v59 = vmul.f32 %v4554_v57, %v3773_v56 }
0x15e2   : > { %v3781_v31 = vmul.f32 %v4126_v58, %v3776_v59 }
0x15e4   : > { %v3786_v61 = vadd.f32 %v4127_v60, %v3781_v31 }
0x15e6   : > { %4444 = vmatmul.mubr.msk.f32.vlgmr.msra.gmra.mxu1 %vm469_vm3, %v3786_v61 }
0x15e7   : > { %4454 = vmatprep.mubr.msk.f32.mxu1 %vm4620_vm0, %v4619_v1  ;;  %4447 = vmatpush3.msra.mxu1 %v3878_v62 }
0x15e8   : > { %4448 = vmatprep.subr.mxu1 %v4619_v1 }
0x15e9   : > { %4449 = vmatpush3.msra.mxu1 %v3876_v63 }
0x15ea   : > { %4450 = vmatprep.subr.mxu1 %v4619_v1 }
0x15eb   : > { %4451 = vmatpush3.msra.mxu1 %v3874_v0 }
0x15ec   : > { %4452 = vmatprep.subr.mxu1 %v4619_v1 }
0x15ed   : > { %4453 = vmatpush3.msra.mxu1 %v3872_v2 }
0x16a6   : > { %v3861_v4 = vpop.f32.mrf.mxu1 }
0x16a7   : > { %v3862_v6 = vadd.f32 %v3861_v4, %v3791_v3 }
0x16a8   : > { %v4445_v7 = vpop.f32.mrf.mxu1 }
0x16a9   : > { %4555 = vtanh.f32 %v3862_v6 }
0x16b6   : > { %v4556_v8 = vpop.eup %4555 }
0x16b7   : > { %4455 = vmatmul.mubr.msk.f32.vlgmr.msra.gmra.mxu1 %vm469_vm3, %v4556_v8 }
0x1777   : > { %v3952_v1 = vpop.f32.mrf.mxu1 }
0x1778   : > { %v3953_v10 = vadd.f32 %v3952_v1, %v3866_v9 }
0x1779   : > { %v4456_v11 = vpop.f32.mrf.mxu1 }
0x177a   : > { %3957 = vst.msk [vmem:[%s358_s29] sm:$0x1] %vm3956_vm7, %v3953_v10 }
0x177b   : > { %4570 = shalt.err (!%p4567_p3)
}
0x177c   : > { %s4571_s25 = scalar_lea.hbm %s5289_s28, 16  ;;  %s4575_s30 = scalar_lea.hbm %s5334_s10, 32 }
0x177d   : > { %p4572_p4 = scmp.ne.s32.totalorder %s5289_s28, %s4571_s25  ;;  %p4576_p9 = scmp.lt.s32.totalorder %s5289_s28, %s5334_s10 }
0x177e   : > { %p4577_p10 = scmp.lt.s32.totalorder %s4575_s30, %s4571_s25 }
0x177f   : > { %p4573_p7 = pnand %p4572_p4, %p4726_p5 }
0x1780   : > { %p4578_p11 = por %p4577_p10, %p4576_p9 }
0x1781   : > { %p4574_p8 = pneg %p4573_p7 }
0x1783   : > { %p4579_p12 = pnand %p4578_p11, %p4574_p8 }
0x1785   : > { %4582 = shalt.err (!%p4579_p12)
}
0x1786   : > { %4457 = dma.vmem_to_hbm [thread:$0]  (%p4726_p5), %s3972_s18, 16, %s5289_s28, %s3959_s12  }
0x1787 PF: > { %p4463_p13 = scmp.ge.s32.totalorder %s4617_s16, 2  ;;  %s3983_s21 = sand.u32 1, %s4605_s13  }
0x1788   : > { %s3984_s11 = scalar_lea.sflag [#allocation3], %s3983_s21 }
0x1789   : > { %p4460_p0 = pnand %p4463_p13, %p4730_p6 }
0x178b   : > { %p4461_p1 = pneg %p4460_p0 }
0x178d   : > { %4600 = dma.done.wait (%p4461_p1), %s3984_s11, 16  }
0x178e   : > { %4602 = vsyncadd (%p4461_p1), %s3984_s11, 4294967280  ;;  %p20_p2 = scmp.ge.s32.totalorder %s4713_s19, 4   ;;  %s5352_s13 = smov %s4609_s14 }
0x178f   : > { %s5353_s14 = smov %s4613_s15  ;;  %s5354_s15 = smov %s4724_s22 }
0x1790   : > { %s5355_s16 = smov %s4713_s19  ;;  %22 = sbr.rel (!%p20_p2) target bundleno = 3 (0x3), region = 103 }
0x1795   :  { %3988 = vsyncpa [#allocation3], 1 }
0x1796   :  { %3990 = vsyncpa [#allocation3 + $0x1], 1 }

</bundles_post_ra>
